<compile_context>
chip_gen: v6e
topology: v6e:2x2x1
jax: 0.10.0
libtpu: 0.0.40
codegen_flags: <defaults>
</compile_context>

<pallas_src>
import math
import functools

import jax
import jax.numpy as jnp
from jax import lax
from jax.experimental import pallas as pl
from jax.experimental.pallas import tpu as pltpu


# ----------------------------- kernel helpers -------------------------------
def _layernorm(x, g, b, eps=1e-5):
    mu = jnp.mean(x, axis=-1, keepdims=True)
    xc = x - mu
    var = jnp.mean(xc * xc, axis=-1, keepdims=True)
    return xc * lax.rsqrt(var + eps) * g + b


def _gelu_exact(x):
    # PyTorch nn.GELU default: exact erf-based GELU (kept exact to match).
    return 0.5 * x * (1.0 + lax.erf(x * (1.0 / math.sqrt(2.0))))


# ----------------------------- kernel body -----------------------------------
def pyraformer_kernel(
    n_heads, head_dim,
    # --- refs (inputs) ---
    x_ref,
    g1_ref, b1_ref, g2_ref, b2_ref,
    wq_ref, bq_ref, wk_ref, bk_ref, wv_ref, bv_ref,
    wo_ref, bo_ref,
    wf1_ref, bf1_ref, wf2_ref, bf2_ref,
    # --- refs (outputs) ---
    out_ref,
):
    bb, S, H = x_ref.shape
    NH, hd = n_heads, head_dim
    NB = NH * bb
    cdt = wq_ref.dtype              # matmul operand dtype (bf16 or f32)

    x = x_ref[...]                                  # (bb, S, H) float32
    x2d = x.reshape(bb * S, H)                      # leading-dim merge (cheap)

    # ---- norm1 (f32) ----
    xn = _layernorm(x2d, g1_ref[...], b1_ref[...])

    # ---- head-batched Q/K/V projections ------------------------------------
    # Head index is kept as a *leading batch dim* of every contraction, so the
    # score / P@V math below is one batched dot_general over (head, batch-row)
    # and there is no minor-dim reshape, no 4-lane slicing, no concatenate.
    xn3 = xn.reshape(bb, S, H).astype(cdt)
    xb = jnp.broadcast_to(xn3[None], (NH, bb, S, H)).reshape(NB, S, H)

    def rep_w(w):  # replicate per-head weight over the batch block: (NH,..)->(NB,..)
        return jnp.broadcast_to(w[:, None], (NH, bb) + w.shape[1:]).reshape(
            (NB,) + w.shape[1:])

    # NOTE: 1/sqrt(head_dim) is already folded into wq/bq by the wrapper.
    q = jnp.einsum("bsh,bhd->bsd", xb, rep_w(wq_ref[...]),
                   preferred_element_type=jnp.float32) + rep_w(bq_ref[...])
    k = jnp.einsum("bsh,bhd->bsd", xb, rep_w(wk_ref[...]),
                   preferred_element_type=jnp.float32) + rep_w(bk_ref[...])
    v = jnp.einsum("bsh,bhd->bsd", xb, rep_w(wv_ref[...]),
                   preferred_element_type=jnp.float32) + rep_w(bv_ref[...])

    # ---- pyramidal masks: only the <=5 distinct dilation masks, built once --
    row = lax.broadcasted_iota(jnp.int32, (S, S), 0)
    col = lax.broadcasted_iota(jnp.int32, (S, S), 1)
    dist = jnp.abs(row - col)
    n_dil = min(5, NH)
    distinct = []
    for m in range(n_dil):
        dil = 2 ** m
        mod = 2 ** (m + 1)   # power of two by construction -> & (mod-1) == % mod
        distinct.append((dist <= dil) | ((dist & (mod - 1)) == 0))   # (S,S) bool
    allowed = jnp.stack([distinct[min(h, n_dil - 1)] for h in range(NH)], axis=0)
    allowed_b = jnp.broadcast_to(allowed[:, None], (NH, bb, S, S)).reshape(NB, S, S)

    # ---- batched scores + softmax with deferred normalization --------------
    s = jnp.einsum("bqd,bkd->bqk", q.astype(cdt), k.astype(cdt),
                   preferred_element_type=jnp.float32)          # (NB, S, S)
    s = jnp.where(allowed_b, s, -jnp.inf)
    # every row keeps its diagonal unmasked -> row max is finite
    mx = jnp.max(s, axis=-1, keepdims=True)
    p = jnp.exp(s - mx)                                          # unnormalized
    l = jnp.sum(p, axis=-1, keepdims=True)                       # (NB, S, 1)
    ctx = jnp.einsum("bqk,bkd->bqd", p.astype(cdt), v.astype(cdt),
                     preferred_element_type=jnp.float32)         # (NB, S, hd)
    ctx = ctx * (1.0 / l)          # normalize S*hd values, not S*S probabilities

    # ---- output projection: batched over heads, then reduced ---------------
    #   concat(heads) @ Wo  ==  sum_h  ctx_h @ Wo_h
    y = jnp.einsum("bqd,bdh->bqh", ctx.astype(cdt), rep_w(wo_ref[...]),
                   preferred_element_type=jnp.float32)           # (NB, S, H)
    attended = jnp.sum(y.reshape(NH, bb * S, H), axis=0) + bo_ref[...]  # (bb*S, H)

    # ---- residual 1 (dropout = identity) ----
    x1 = x2d + attended

    # ---- norm2 + feed-forward ----
    xn2 = _layernorm(x1, g2_ref[...], b2_ref[...])
    h1 = jnp.dot(xn2.astype(cdt), wf1_ref[...],
                 preferred_element_type=jnp.float32) + bf1_ref[...]
    h1 = _gelu_exact(h1)
    ff = jnp.dot(h1.astype(cdt), wf2_ref[...],
                 preferred_element_type=jnp.float32) + bf2_ref[...]

    # ---- residual 2 ----
    out_ref[...] = (x1 + ff).reshape(bb, S, H)


# ------------------------------ wrapper -------------------------------------
def pyraformer_block(x, params, n_heads, head_dim, *,
                     matmul_dtype=jnp.bfloat16, max_batch_block=8):
    B, S, H = x.shape
    mdt = matmul_dtype
    scale = 1.0 / math.sqrt(head_dim)

    # Fold the attention scale into the Q projection (zero in-kernel cost) and
    # pre-cast matmul weights to the compute dtype (bf16 is MXU-native on
    # v5e/v6e/v7x).  Biases and LayerNorm params stay f32.
    wq = (params["wq"] * scale).astype(mdt)
    bq = (params["bq"] * scale).astype(jnp.float32)
    wk = params["wk"].astype(mdt)
    wv = params["wv"].astype(mdt)
    wo = params["wo"].astype(mdt)
    wf1 = params["wf1"].astype(mdt)
    wf2 = params["wf2"].astype(mdt)

    weight_args = (
        params["g1"], params["b1"], params["g2"], params["b2"],
        wq, bq, wk, params["bk"], wv, params["bv"],
        wo, params["bo"],
        wf1, params["bf1"], wf2, params["bf2"],
    )

    # batch rows per grid step: keep >= 2 grid steps when B >= 2 so the
    # "parallel" axis has something to shard across v7x's two TensorCores.
    limit = min(max_batch_block, B)
    if B >= 2:
        limit = min(limit, B // 2)
    bb = 1
    for cand in range(max(limit, 1), 0, -1):
        if B % cand == 0:
            bb = cand
            break
    grid = (B // bb,)

    def full_spec(arr):
        nd = arr.ndim
        return pl.BlockSpec(arr.shape, lambda b, _nd=nd: (0,) * _nd)

    # TODO(synk): at realistic H, single-buffer the (grid-invariant) weight
    # blocks and tile the FFN over the 4H axis; at these toy shapes all
    # weights together are a few KiB.
    in_specs = [pl.BlockSpec((bb, S, H), lambda b: (b, 0, 0))] + [
        full_spec(a) for a in weight_args
    ]
    out_spec = pl.BlockSpec((bb, S, H), lambda b: (b, 0, 0))

    kernel = functools.partial(pyraformer_kernel, n_heads, head_dim)

    return pl.pallas_call(
        kernel,
        out_shape=jax.ShapeDtypeStruct((B, S, H), jnp.float32),
        grid_spec=pltpu.PrefetchScalarGridSpec(
            num_scalar_prefetch=0,
            grid=grid,
            in_specs=in_specs,
            out_specs=out_spec,
        ),
        compiler_params=pltpu.CompilerParams(
            dimension_semantics=("parallel",),
            vmem_limit_bytes=32 * 1024 * 1024,
        ),
    )(x, *weight_args)


# --------------------------- mask construction (reference only) -------------
def build_head_masks(seq_len, n_heads):
    dilations = [2 ** i for i in range(min(5, n_heads))]
    idx = jnp.arange(seq_len)
    d = jnp.abs(idx[:, None] - idx[None, :])
    base = []
    for h, dil in enumerate(dilations):
        m = jnp.where((d <= dil) | (d % (2 ** (h + 1)) == 0), 1.0, 0.0)
        base.append(m.astype(jnp.float32))
    base = jnp.stack(base)                                   # (n_dil, S, S)
    head_masks = jnp.stack(
        [base[min(h, len(dilations) - 1)] for h in range(n_heads)]
    )                                                        # (n_heads, S, S)
    return head_masks


# ------------------------ deterministic parameter init ----------------------
def init_params(key, hidden_dim, n_heads):
    head_dim = hidden_dim // n_heads
    ks = jax.random.split(key, 16)
    s = 0.1
    p = {
        # per-head projections, stored as W.T : (nh, H, hd); biases (nh, 1, hd)
        "wq": jax.random.normal(ks[0], (n_heads, hidden_dim, head_dim), jnp.float32) * s,
        "bq": jax.random.normal(ks[1], (n_heads, 1, head_dim), jnp.float32) * s,
        "wk": jax.random.normal(ks[2], (n_heads, hidden_dim, head_dim), jnp.float32) * s,
        "bk": jax.random.normal(ks[3], (n_heads, 1, head_dim), jnp.float32) * s,
        "wv": jax.random.normal(ks[4], (n_heads, hidden_dim, head_dim), jnp.float32) * s,
        "bv": jax.random.normal(ks[5], (n_heads, 1, head_dim), jnp.float32) * s,
        # output projection W.T split per head-slice: (nh, hd, H); bias (1, H)
        "wo": jax.random.normal(ks[6], (n_heads, head_dim, hidden_dim), jnp.float32) * s,
        "bo": jax.random.normal(ks[7], (1, hidden_dim), jnp.float32) * s,
        # feed-forward (pre-transposed)
        "wf1": jax.random.normal(ks[8], (hidden_dim, 4 * hidden_dim), jnp.float32) * s,
        "bf1": jax.random.normal(ks[9], (1, 4 * hidden_dim), jnp.float32) * s,
        "wf2": jax.random.normal(ks[10], (4 * hidden_dim, hidden_dim), jnp.float32) * s,
        "bf2": jax.random.normal(ks[11], (1, hidden_dim), jnp.float32) * s,
        # layer norms
        "g1": 1.0 + jax.random.normal(ks[12], (1, hidden_dim), jnp.float32) * 0.02,
        "b1": jax.random.normal(ks[13], (1, hidden_dim), jnp.float32) * 0.02,
        "g2": 1.0 + jax.random.normal(ks[14], (1, hidden_dim), jnp.float32) * 0.02,
        "b2": jax.random.normal(ks[15], (1, hidden_dim), jnp.float32) * 0.02,
    }
    return p, head_dim


# ----------------------------- pure-JAX reference ----------------------------
def reference(x, params, head_masks, n_heads, head_dim):
    def ln(t, g, b):
        mu = jnp.mean(t, axis=-1, keepdims=True)
        var = jnp.mean((t - mu) ** 2, axis=-1, keepdims=True)
        return (t - mu) / jnp.sqrt(var + 1e-5) * g + b

    xn = ln(x, params["g1"], params["b1"])
    heads = []
    for h in range(n_heads):
        q = xn @ params["wq"][h] + params["bq"][h]
        k = xn @ params["wk"][h] + params["bk"][h]
        v = xn @ params["wv"][h] + params["bv"][h]
        sc = jnp.einsum("bqd,bkd->bqk", q, k) / math.sqrt(head_dim)
        sc = jnp.where(head_masks[h][None] == 0.0, -jnp.inf, sc)
        pr = jax.nn.softmax(sc, axis=-1)
        heads.append(pr @ v)
    attended = params["bo"] + sum(
        heads[h] @ params["wo"][h] for h in range(n_heads)
    )
    x1 = x + attended
    xn2 = ln(x1, params["g2"], params["b2"])
    h1 = xn2 @ params["wf1"] + params["bf1"]
    h1 = 0.5 * h1 * (1.0 + lax.erf(h1 / math.sqrt(2.0)))
    ff = h1 @ params["wf2"] + params["bf2"]
    return x1 + ff


# --------------------------------- main --------------------------------------
if __name__ == "__main__":
    B, S, H, NH = 2, 8, 32, 8

    key = jax.random.PRNGKey(0)
    kx, kp = jax.random.split(key)
    x = jax.random.normal(kx, (B, S, H), jnp.float32)

    params, head_dim = init_params(kp, H, NH)

    head_masks = build_head_masks(S, NH)
    ref = reference(x, params, head_masks, NH, head_dim)

    # 1) f32 matmul operands: exact-semantics check against the reference.
    out_f32 = pyraformer_block(x, params, NH, head_dim, matmul_dtype=jnp.float32)
    out_f32 = jax.block_until_ready(out_f32)
    assert out_f32.shape == (B, S, H)
    assert jnp.allclose(out_f32, ref, atol=1e-4, rtol=1e-4), "f32 mismatch vs. reference"

    # 2) bf16 matmul operands (perf configuration): looser tolerance for the
    #    bf16 operand rounding; accumulation stays f32.
    out_bf16 = pyraformer_block(x, params, NH, head_dim, matmul_dtype=jnp.bfloat16)
    out_bf16 = jax.block_until_ready(out_bf16)
    assert out_bf16.shape == (B, S, H)
    assert jnp.allclose(out_bf16, ref, atol=5e-2, rtol=5e-2), "bf16 mismatch vs. reference"

    print("KERNEL_OK")
</pallas_src>

<mosaic_0001>
module attributes {stable_mosaic.version = 11 : i64} {
  func.func @pyraformer_kernel(%arg0: i32, %arg1: memref<1x8x32xf32, #tpu.memory_space<vmem>>, %arg2: memref<1x32xf32, #tpu.memory_space<vmem>>, %arg3: memref<1x32xf32, #tpu.memory_space<vmem>>, %arg4: memref<1x32xf32, #tpu.memory_space<vmem>>, %arg5: memref<1x32xf32, #tpu.memory_space<vmem>>, %arg6: memref<8x32x4xf32, #tpu.memory_space<vmem>>, %arg7: memref<8x1x4xf32, #tpu.memory_space<vmem>>, %arg8: memref<8x32x4xf32, #tpu.memory_space<vmem>>, %arg9: memref<8x1x4xf32, #tpu.memory_space<vmem>>, %arg10: memref<8x32x4xf32, #tpu.memory_space<vmem>>, %arg11: memref<8x1x4xf32, #tpu.memory_space<vmem>>, %arg12: memref<8x4x32xf32, #tpu.memory_space<vmem>>, %arg13: memref<1x32xf32, #tpu.memory_space<vmem>>, %arg14: memref<32x128xf32, #tpu.memory_space<vmem>>, %arg15: memref<1x128xf32, #tpu.memory_space<vmem>>, %arg16: memref<128x32xf32, #tpu.memory_space<vmem>>, %arg17: memref<1x32xf32, #tpu.memory_space<vmem>>, %arg18: memref<1x8x32xf32, #tpu.memory_space<vmem>>) attributes {dimension_semantics = [#tpu.dimension_semantics<parallel>], iteration_bounds = array<i64: 2>, scalar_prefetch = 0 : i64, scratch_operands = 0 : i64, tpu.core_type = #tpu.core_type<tc>, window_params = [{transform_indices = @transform_0, window_bounds = array<i64: 1, 8, 32>}, {pipeline_mode = #tpu.pipeline_mode<synchronous>, transform_indices = @transform_1, window_bounds = array<i64: 1, 32>}, {pipeline_mode = #tpu.pipeline_mode<synchronous>, transform_indices = @transform_2, window_bounds = array<i64: 1, 32>}, {pipeline_mode = #tpu.pipeline_mode<synchronous>, transform_indices = @transform_3, window_bounds = array<i64: 1, 32>}, {pipeline_mode = #tpu.pipeline_mode<synchronous>, transform_indices = @transform_4, window_bounds = array<i64: 1, 32>}, {pipeline_mode = #tpu.pipeline_mode<synchronous>, transform_indices = @transform_5, window_bounds = array<i64: 8, 32, 4>}, {pipeline_mode = #tpu.pipeline_mode<synchronous>, transform_indices = @transform_6, window_bounds = array<i64: 8, 1, 4>}, {pipeline_mode = #tpu.pipeline_mode<synchronous>, transform_indices = @transform_7, window_bounds = array<i64: 8, 32, 4>}, {pipeline_mode = #tpu.pipeline_mode<synchronous>, transform_indices = @transform_8, window_bounds = array<i64: 8, 1, 4>}, {pipeline_mode = #tpu.pipeline_mode<synchronous>, transform_indices = @transform_9, window_bounds = array<i64: 8, 32, 4>}, {pipeline_mode = #tpu.pipeline_mode<synchronous>, transform_indices = @transform_10, window_bounds = array<i64: 8, 1, 4>}, {pipeline_mode = #tpu.pipeline_mode<synchronous>, transform_indices = @transform_11, window_bounds = array<i64: 8, 4, 32>}, {pipeline_mode = #tpu.pipeline_mode<synchronous>, transform_indices = @transform_12, window_bounds = array<i64: 1, 32>}, {pipeline_mode = #tpu.pipeline_mode<synchronous>, transform_indices = @transform_13, window_bounds = array<i64: 32, 128>}, {pipeline_mode = #tpu.pipeline_mode<synchronous>, transform_indices = @transform_14, window_bounds = array<i64: 1, 128>}, {pipeline_mode = #tpu.pipeline_mode<synchronous>, transform_indices = @transform_15, window_bounds = array<i64: 128, 32>}, {pipeline_mode = #tpu.pipeline_mode<synchronous>, transform_indices = @transform_16, window_bounds = array<i64: 1, 32>}, {transform_indices = @transform_17, window_bounds = array<i64: 1, 8, 32>}]} {
    %c0 = arith.constant 0 : index
    %c0_0 = arith.constant 0 : index
    %c0_1 = arith.constant 0 : index
    %0 = vector.load %arg1[%c0, %c0_0, %c0_1] : memref<1x8x32xf32, #tpu.memory_space<vmem>>, vector<1x8x32xf32>
    %1 = vector.shape_cast %0 : vector<1x8x32xf32> to vector<8x32xf32>
    %c0_2 = arith.constant 0 : index
    %c0_3 = arith.constant 0 : index
    %2 = vector.load %arg2[%c0_2, %c0_3] : memref<1x32xf32, #tpu.memory_space<vmem>>, vector<1x32xf32>
    %c0_4 = arith.constant 0 : index
    %c0_5 = arith.constant 0 : index
    %3 = vector.load %arg3[%c0_4, %c0_5] : memref<1x32xf32, #tpu.memory_space<vmem>>, vector<1x32xf32>
    %cst = arith.constant dense<0.000000e+00> : vector<8xf32>
    %4 = vector.multi_reduction <add>, %1, %cst [1] : vector<8x32xf32> to vector<8xf32>
    %5 = vector.shape_cast %4 : vector<8xf32> to vector<8x1xf32>
    %cst_6 = arith.constant 3.200000e+01 : f32
    %6 = vector.broadcast %cst_6 : f32 to vector<8x1xf32>
    %7 = arith.divf %5, %6 : vector<8x1xf32>
    %8 = vector.broadcast %7 : vector<8x1xf32> to vector<8x32xf32>
    %9 = arith.subf %1, %8 : vector<8x32xf32>
    %10 = arith.mulf %9, %9 : vector<8x32xf32>
    %cst_7 = arith.constant dense<0.000000e+00> : vector<8xf32>
    %11 = vector.multi_reduction <add>, %10, %cst_7 [1] : vector<8x32xf32> to vector<8xf32>
    %12 = vector.shape_cast %11 : vector<8xf32> to vector<8x1xf32>
    %cst_8 = arith.constant 3.200000e+01 : f32
    %13 = vector.broadcast %cst_8 : f32 to vector<8x1xf32>
    %14 = arith.divf %12, %13 : vector<8x1xf32>
    %cst_9 = arith.constant 9.99999974E-6 : f32
    %15 = vector.broadcast %cst_9 : f32 to vector<8x1xf32>
    %16 = arith.addf %14, %15 : vector<8x1xf32>
    %17 = math.rsqrt %16 : vector<8x1xf32>
    %18 = vector.broadcast %17 : vector<8x1xf32> to vector<8x32xf32>
    %19 = arith.mulf %9, %18 : vector<8x32xf32>
    %20 = vector.broadcast %2 : vector<1x32xf32> to vector<8x32xf32>
    %21 = arith.mulf %19, %20 : vector<8x32xf32>
    %22 = vector.broadcast %3 : vector<1x32xf32> to vector<8x32xf32>
    %23 = arith.addf %21, %22 : vector<8x32xf32>
    %24 = vector.shape_cast %23 : vector<8x32xf32> to vector<1x8x32xf32>
    %25 = vector.shape_cast %24 : vector<1x8x32xf32> to vector<1x1x8x32xf32>
    %26 = vector.shape_cast %25 : vector<1x1x8x32xf32> to vector<1x1x8x32xf32>
    %27 = vector.broadcast %26 : vector<1x1x8x32xf32> to vector<8x1x8x32xf32>
    %28 = vector.shape_cast %27 : vector<8x1x8x32xf32> to vector<8x8x32xf32>
    %c0_10 = arith.constant 0 : index
    %c0_11 = arith.constant 0 : index
    %c0_12 = arith.constant 0 : index
    %29 = vector.load %arg6[%c0_10, %c0_11, %c0_12] : memref<8x32x4xf32, #tpu.memory_space<vmem>>, vector<8x32x4xf32>
    %30 = vector.shape_cast %29 : vector<8x32x4xf32> to vector<8x1x32x4xf32>
    %31 = vector.shape_cast %30 : vector<8x1x32x4xf32> to vector<8x32x4xf32>
    "tpu.trace_start"() <{level = 10 : i32, message = "bsh,bhd->bsd"}> : () -> ()
    %cst_13 = arith.constant dense<0.000000e+00> : vector<8x8x4xf32>
    %32 = tpu.matmul %28, %31, %cst_13 {dimension_numbers = #tpu.dot_dimension_numbers<[2], [1], [1], [2], [0, 0, 0, 1, 1, 2], [0], [0]>} : vector<8x8x32xf32>, vector<8x32x4xf32>, vector<8x8x4xf32> -> vector<8x8x4xf32>
    "tpu.trace_stop"() : () -> ()
    %c0_14 = arith.constant 0 : index
    %c0_15 = arith.constant 0 : index
    %c0_16 = arith.constant 0 : index
    %33 = vector.load %arg7[%c0_14, %c0_15, %c0_16] : memref<8x1x4xf32, #tpu.memory_space<vmem>>, vector<8x1x4xf32>
    %34 = vector.shape_cast %33 : vector<8x1x4xf32> to vector<8x1x1x4xf32>
    %35 = vector.shape_cast %34 : vector<8x1x1x4xf32> to vector<8x1x4xf32>
    %36 = vector.broadcast %35 : vector<8x1x4xf32> to vector<8x8x4xf32>
    %37 = arith.addf %32, %36 : vector<8x8x4xf32>
    %c0_17 = arith.constant 0 : index
    %c0_18 = arith.constant 0 : index
    %c0_19 = arith.constant 0 : index
    %38 = vector.load %arg8[%c0_17, %c0_18, %c0_19] : memref<8x32x4xf32, #tpu.memory_space<vmem>>, vector<8x32x4xf32>
    %39 = vector.shape_cast %38 : vector<8x32x4xf32> to vector<8x1x32x4xf32>
    %40 = vector.shape_cast %39 : vector<8x1x32x4xf32> to vector<8x32x4xf32>
    "tpu.trace_start"() <{level = 10 : i32, message = "bsh,bhd->bsd"}> : () -> ()
    %cst_20 = arith.constant dense<0.000000e+00> : vector<8x8x4xf32>
    %41 = tpu.matmul %28, %40, %cst_20 {dimension_numbers = #tpu.dot_dimension_numbers<[2], [1], [1], [2], [0, 0, 0, 1, 1, 2], [0], [0]>} : vector<8x8x32xf32>, vector<8x32x4xf32>, vector<8x8x4xf32> -> vector<8x8x4xf32>
    "tpu.trace_stop"() : () -> ()
    %c0_21 = arith.constant 0 : index
    %c0_22 = arith.constant 0 : index
    %c0_23 = arith.constant 0 : index
    %42 = vector.load %arg9[%c0_21, %c0_22, %c0_23] : memref<8x1x4xf32, #tpu.memory_space<vmem>>, vector<8x1x4xf32>
    %43 = vector.shape_cast %42 : vector<8x1x4xf32> to vector<8x1x1x4xf32>
    %44 = vector.shape_cast %43 : vector<8x1x1x4xf32> to vector<8x1x4xf32>
    %45 = vector.broadcast %44 : vector<8x1x4xf32> to vector<8x8x4xf32>
    %46 = arith.addf %41, %45 : vector<8x8x4xf32>
    %c0_24 = arith.constant 0 : index
    %c0_25 = arith.constant 0 : index
    %c0_26 = arith.constant 0 : index
    %47 = vector.load %arg10[%c0_24, %c0_25, %c0_26] : memref<8x32x4xf32, #tpu.memory_space<vmem>>, vector<8x32x4xf32>
    %48 = vector.shape_cast %47 : vector<8x32x4xf32> to vector<8x1x32x4xf32>
    %49 = vector.shape_cast %48 : vector<8x1x32x4xf32> to vector<8x32x4xf32>
    "tpu.trace_start"() <{level = 10 : i32, message = "bsh,bhd->bsd"}> : () -> ()
    %cst_27 = arith.constant dense<0.000000e+00> : vector<8x8x4xf32>
    %50 = tpu.matmul %28, %49, %cst_27 {dimension_numbers = #tpu.dot_dimension_numbers<[2], [1], [1], [2], [0, 0, 0, 1, 1, 2], [0], [0]>} : vector<8x8x32xf32>, vector<8x32x4xf32>, vector<8x8x4xf32> -> vector<8x8x4xf32>
    "tpu.trace_stop"() : () -> ()
    %c0_28 = arith.constant 0 : index
    %c0_29 = arith.constant 0 : index
    %c0_30 = arith.constant 0 : index
    %51 = vector.load %arg11[%c0_28, %c0_29, %c0_30] : memref<8x1x4xf32, #tpu.memory_space<vmem>>, vector<8x1x4xf32>
    %52 = vector.shape_cast %51 : vector<8x1x4xf32> to vector<8x1x1x4xf32>
    %53 = vector.shape_cast %52 : vector<8x1x1x4xf32> to vector<8x1x4xf32>
    %54 = vector.broadcast %53 : vector<8x1x4xf32> to vector<8x8x4xf32>
    %55 = arith.addf %50, %54 : vector<8x8x4xf32>
    %56 = tpu.iota {dimensions = array<i32: 0>} : vector<8x8xi32>
    %57 = tpu.iota {dimensions = array<i32: 1>} : vector<8x8xi32>
    %58 = arith.subi %56, %57 : vector<8x8xi32>
    %59 = math.absi %58 : vector<8x8xi32>
    %c1_i32 = arith.constant 1 : i32
    %60 = vector.broadcast %c1_i32 : i32 to vector<8x8xi32>
    %61 = arith.cmpi sle, %59, %60 : vector<8x8xi32>
    %c1_i32_31 = arith.constant 1 : i32
    %62 = vector.broadcast %c1_i32_31 : i32 to vector<8x8xi32>
    %63 = arith.andi %59, %62 : vector<8x8xi32>
    %c0_i32 = arith.constant 0 : i32
    %64 = vector.broadcast %c0_i32 : i32 to vector<8x8xi32>
    %65 = arith.cmpi eq, %63, %64 : vector<8x8xi32>
    %66 = arith.ori %61, %65 : vector<8x8xi1>
    %c2_i32 = arith.constant 2 : i32
    %67 = vector.broadcast %c2_i32 : i32 to vector<8x8xi32>
    %68 = arith.cmpi sle, %59, %67 : vector<8x8xi32>
    %c3_i32 = arith.constant 3 : i32
    %69 = vector.broadcast %c3_i32 : i32 to vector<8x8xi32>
    %70 = arith.andi %59, %69 : vector<8x8xi32>
    %c0_i32_32 = arith.constant 0 : i32
    %71 = vector.broadcast %c0_i32_32 : i32 to vector<8x8xi32>
    %72 = arith.cmpi eq, %70, %71 : vector<8x8xi32>
    %73 = arith.ori %68, %72 : vector<8x8xi1>
    %c4_i32 = arith.constant 4 : i32
    %74 = vector.broadcast %c4_i32 : i32 to vector<8x8xi32>
    %75 = arith.cmpi sle, %59, %74 : vector<8x8xi32>
    %c7_i32 = arith.constant 7 : i32
    %76 = vector.broadcast %c7_i32 : i32 to vector<8x8xi32>
    %77 = arith.andi %59, %76 : vector<8x8xi32>
    %c0_i32_33 = arith.constant 0 : i32
    %78 = vector.broadcast %c0_i32_33 : i32 to vector<8x8xi32>
    %79 = arith.cmpi eq, %77, %78 : vector<8x8xi32>
    %80 = arith.ori %75, %79 : vector<8x8xi1>
    %c8_i32 = arith.constant 8 : i32
    %81 = vector.broadcast %c8_i32 : i32 to vector<8x8xi32>
    %82 = arith.cmpi sle, %59, %81 : vector<8x8xi32>
    %c15_i32 = arith.constant 15 : i32
    %83 = vector.broadcast %c15_i32 : i32 to vector<8x8xi32>
    %84 = arith.andi %59, %83 : vector<8x8xi32>
    %c0_i32_34 = arith.constant 0 : i32
    %85 = vector.broadcast %c0_i32_34 : i32 to vector<8x8xi32>
    %86 = arith.cmpi eq, %84, %85 : vector<8x8xi32>
    %87 = arith.ori %82, %86 : vector<8x8xi1>
    %c16_i32 = arith.constant 16 : i32
    %88 = vector.broadcast %c16_i32 : i32 to vector<8x8xi32>
    %89 = arith.cmpi sle, %59, %88 : vector<8x8xi32>
    %c31_i32 = arith.constant 31 : i32
    %90 = vector.broadcast %c31_i32 : i32 to vector<8x8xi32>
    %91 = arith.andi %59, %90 : vector<8x8xi32>
    %c0_i32_35 = arith.constant 0 : i32
    %92 = vector.broadcast %c0_i32_35 : i32 to vector<8x8xi32>
    %93 = arith.cmpi eq, %91, %92 : vector<8x8xi32>
    %94 = arith.ori %89, %93 : vector<8x8xi1>
    %95 = vector.shape_cast %66 : vector<8x8xi1> to vector<1x8x8xi1>
    %96 = vector.shape_cast %73 : vector<8x8xi1> to vector<1x8x8xi1>
    %97 = vector.shape_cast %80 : vector<8x8xi1> to vector<1x8x8xi1>
    %98 = vector.shape_cast %87 : vector<8x8xi1> to vector<1x8x8xi1>
    %99 = vector.shape_cast %94 : vector<8x8xi1> to vector<1x8x8xi1>
    %100 = vector.shape_cast %94 : vector<8x8xi1> to vector<1x8x8xi1>
    %101 = vector.shape_cast %94 : vector<8x8xi1> to vector<1x8x8xi1>
    %102 = vector.shape_cast %94 : vector<8x8xi1> to vector<1x8x8xi1>
    %103 = tpu.concatenate %95, %96, %97, %98, %99, %100, %101, %102 in 0 : vector<1x8x8xi1>, vector<1x8x8xi1>, vector<1x8x8xi1>, vector<1x8x8xi1>, vector<1x8x8xi1>, vector<1x8x8xi1>, vector<1x8x8xi1>, vector<1x8x8xi1> -> vector<8x8x8xi1>
    %104 = vector.shape_cast %103 : vector<8x8x8xi1> to vector<8x1x8x8xi1>
    %105 = vector.shape_cast %104 : vector<8x1x8x8xi1> to vector<8x8x8xi1>
    "tpu.trace_start"() <{level = 10 : i32, message = "bqd,bkd->bqk"}> : () -> ()
    %cst_36 = arith.constant dense<0.000000e+00> : vector<8x8x8xf32>
    %106 = tpu.matmul %37, %46, %cst_36 {dimension_numbers = #tpu.dot_dimension_numbers<[2], [2], [1], [1], [0, 0, 0, 1, 1, 1], [0], [0]>} : vector<8x8x4xf32>, vector<8x8x4xf32>, vector<8x8x8xf32> -> vector<8x8x8xf32>
    %cst_37 = arith.constant 0xFF800000 : f32
    "tpu.trace_stop"() : () -> ()
    %107 = vector.broadcast %cst_37 : f32 to vector<8x8x8xf32>
    %108 = arith.select %105, %106, %107 : vector<8x8x8xi1>, vector<8x8x8xf32>
    %cst_38 = arith.constant dense<0xFF800000> : vector<8x8xf32>
    %109 = vector.multi_reduction <maximumf>, %108, %cst_38 [2] : vector<8x8x8xf32> to vector<8x8xf32>
    %110 = vector.shape_cast %109 : vector<8x8xf32> to vector<8x8x1xf32>
    %111 = vector.broadcast %110 : vector<8x8x1xf32> to vector<8x8x8xf32>
    %112 = arith.subf %108, %111 : vector<8x8x8xf32>
    %113 = math.exp %112 : vector<8x8x8xf32>
    %cst_39 = arith.constant dense<0.000000e+00> : vector<8x8xf32>
    %114 = vector.multi_reduction <add>, %113, %cst_39 [2] : vector<8x8x8xf32> to vector<8x8xf32>
    %115 = vector.shape_cast %114 : vector<8x8xf32> to vector<8x8x1xf32>
    "tpu.trace_start"() <{level = 10 : i32, message = "bqk,bkd->bqd"}> : () -> ()
    %cst_40 = arith.constant dense<0.000000e+00> : vector<8x8x4xf32>
    %116 = tpu.matmul %113, %55, %cst_40 {dimension_numbers = #tpu.dot_dimension_numbers<[2], [1], [1], [2], [0, 0, 0, 1, 1, 2], [0], [0]>} : vector<8x8x8xf32>, vector<8x8x4xf32>, vector<8x8x4xf32> -> vector<8x8x4xf32>
    "tpu.trace_stop"() : () -> ()
    %cst_41 = arith.constant 1.000000e+00 : f32
    %117 = vector.broadcast %cst_41 : f32 to vector<8x8x1xf32>
    %118 = arith.divf %117, %115 : vector<8x8x1xf32>
    %119 = vector.broadcast %118 : vector<8x8x1xf32> to vector<8x8x4xf32>
    %120 = arith.mulf %116, %119 : vector<8x8x4xf32>
    %c0_42 = arith.constant 0 : index
    %c0_43 = arith.constant 0 : index
    %c0_44 = arith.constant 0 : index
    %121 = vector.load %arg12[%c0_42, %c0_43, %c0_44] : memref<8x4x32xf32, #tpu.memory_space<vmem>>, vector<8x4x32xf32>
    %122 = vector.shape_cast %121 : vector<8x4x32xf32> to vector<8x1x4x32xf32>
    %123 = vector.shape_cast %122 : vector<8x1x4x32xf32> to vector<8x4x32xf32>
    "tpu.trace_start"() <{level = 10 : i32, message = "bqd,bdh->bqh"}> : () -> ()
    %cst_45 = arith.constant dense<0.000000e+00> : vector<8x8x32xf32>
    %124 = tpu.matmul %120, %123, %cst_45 {dimension_numbers = #tpu.dot_dimension_numbers<[2], [1], [1], [2], [0, 0, 0, 1, 1, 2], [0], [0]>} : vector<8x8x4xf32>, vector<8x4x32xf32>, vector<8x8x32xf32> -> vector<8x8x32xf32>
    "tpu.trace_stop"() : () -> ()
    %cst_46 = arith.constant dense<0.000000e+00> : vector<8x32xf32>
    %125 = vector.multi_reduction <add>, %124, %cst_46 [0] : vector<8x8x32xf32> to vector<8x32xf32>
    %c0_47 = arith.constant 0 : index
    %c0_48 = arith.constant 0 : index
    %126 = vector.load %arg13[%c0_47, %c0_48] : memref<1x32xf32, #tpu.memory_space<vmem>>, vector<1x32xf32>
    %127 = vector.broadcast %126 : vector<1x32xf32> to vector<8x32xf32>
    %128 = arith.addf %125, %127 : vector<8x32xf32>
    %129 = arith.addf %1, %128 : vector<8x32xf32>
    %c0_49 = arith.constant 0 : index
    %c0_50 = arith.constant 0 : index
    %130 = vector.load %arg4[%c0_49, %c0_50] : memref<1x32xf32, #tpu.memory_space<vmem>>, vector<1x32xf32>
    %c0_51 = arith.constant 0 : index
    %c0_52 = arith.constant 0 : index
    %131 = vector.load %arg5[%c0_51, %c0_52] : memref<1x32xf32, #tpu.memory_space<vmem>>, vector<1x32xf32>
    %cst_53 = arith.constant dense<0.000000e+00> : vector<8xf32>
    %132 = vector.multi_reduction <add>, %129, %cst_53 [1] : vector<8x32xf32> to vector<8xf32>
    %133 = vector.shape_cast %132 : vector<8xf32> to vector<8x1xf32>
    %cst_54 = arith.constant 3.200000e+01 : f32
    %134 = vector.broadcast %cst_54 : f32 to vector<8x1xf32>
    %135 = arith.divf %133, %134 : vector<8x1xf32>
    %136 = vector.broadcast %135 : vector<8x1xf32> to vector<8x32xf32>
    %137 = arith.subf %129, %136 : vector<8x32xf32>
    %138 = arith.mulf %137, %137 : vector<8x32xf32>
    %cst_55 = arith.constant dense<0.000000e+00> : vector<8xf32>
    %139 = vector.multi_reduction <add>, %138, %cst_55 [1] : vector<8x32xf32> to vector<8xf32>
    %140 = vector.shape_cast %139 : vector<8xf32> to vector<8x1xf32>
    %cst_56 = arith.constant 3.200000e+01 : f32
    %141 = vector.broadcast %cst_56 : f32 to vector<8x1xf32>
    %142 = arith.divf %140, %141 : vector<8x1xf32>
    %cst_57 = arith.constant 9.99999974E-6 : f32
    %143 = vector.broadcast %cst_57 : f32 to vector<8x1xf32>
    %144 = arith.addf %142, %143 : vector<8x1xf32>
    %145 = math.rsqrt %144 : vector<8x1xf32>
    %146 = vector.broadcast %145 : vector<8x1xf32> to vector<8x32xf32>
    %147 = arith.mulf %137, %146 : vector<8x32xf32>
    %148 = vector.broadcast %130 : vector<1x32xf32> to vector<8x32xf32>
    %149 = arith.mulf %147, %148 : vector<8x32xf32>
    %150 = vector.broadcast %131 : vector<1x32xf32> to vector<8x32xf32>
    %151 = arith.addf %149, %150 : vector<8x32xf32>
    %c0_58 = arith.constant 0 : index
    %c0_59 = arith.constant 0 : index
    %152 = vector.load %arg14[%c0_58, %c0_59] : memref<32x128xf32, #tpu.memory_space<vmem>>, vector<32x128xf32>
    %cst_60 = arith.constant dense<0.000000e+00> : vector<8x128xf32>
    %153 = tpu.matmul %151, %152, %cst_60 {dimension_numbers = #tpu.dot_dimension_numbers<[1], [0], [0], [1], [0, 0, 1, 1], [], []>} : vector<8x32xf32>, vector<32x128xf32>, vector<8x128xf32> -> vector<8x128xf32>
    %c0_61 = arith.constant 0 : index
    %c0_62 = arith.constant 0 : index
    %154 = vector.load %arg15[%c0_61, %c0_62] : memref<1x128xf32, #tpu.memory_space<vmem>>, vector<1x128xf32>
    %155 = vector.broadcast %154 : vector<1x128xf32> to vector<8x128xf32>
    %156 = arith.addf %153, %155 : vector<8x128xf32>
    %cst_63 = arith.constant 5.000000e-01 : f32
    %157 = vector.broadcast %cst_63 : f32 to vector<8x128xf32>
    %158 = arith.mulf %157, %156 : vector<8x128xf32>
    %cst_64 = arith.constant 0.707106769 : f32
    %159 = vector.broadcast %cst_64 : f32 to vector<8x128xf32>
    %160 = arith.mulf %156, %159 : vector<8x128xf32>
    %161 = math.erf %160 : vector<8x128xf32>
    %cst_65 = arith.constant 1.000000e+00 : f32
    %162 = vector.broadcast %cst_65 : f32 to vector<8x128xf32>
    %163 = arith.addf %162, %161 : vector<8x128xf32>
    %164 = arith.mulf %158, %163 : vector<8x128xf32>
    %c0_66 = arith.constant 0 : index
    %c0_67 = arith.constant 0 : index
    %165 = vector.load %arg16[%c0_66, %c0_67] : memref<128x32xf32, #tpu.memory_space<vmem>>, vector<128x32xf32>
    %cst_68 = arith.constant dense<0.000000e+00> : vector<8x32xf32>
    %166 = tpu.matmul %164, %165, %cst_68 {dimension_numbers = #tpu.dot_dimension_numbers<[1], [0], [0], [1], [0, 0, 1, 1], [], []>} : vector<8x128xf32>, vector<128x32xf32>, vector<8x32xf32> -> vector<8x32xf32>
    %c0_69 = arith.constant 0 : index
    %c0_70 = arith.constant 0 : index
    %167 = vector.load %arg17[%c0_69, %c0_70] : memref<1x32xf32, #tpu.memory_space<vmem>>, vector<1x32xf32>
    %168 = vector.broadcast %167 : vector<1x32xf32> to vector<8x32xf32>
    %169 = arith.addf %166, %168 : vector<8x32xf32>
    %170 = arith.addf %129, %169 : vector<8x32xf32>
    %171 = vector.shape_cast %170 : vector<8x32xf32> to vector<1x8x32xf32>
    %c0_71 = arith.constant 0 : index
    %c0_72 = arith.constant 0 : index
    %c0_73 = arith.constant 0 : index
    %172 = vector.load %arg18[%c0_71, %c0_72, %c0_73] : memref<1x8x32xf32, #tpu.memory_space<vmem>>, vector<1x8x32xf32>
    tpu.vector_store %arg18[%c0_71, %c0_72, %c0_73], %171 {strides = array<i32>} : memref<1x8x32xf32, #tpu.memory_space<vmem>>, vector<1x8x32xf32>,
    return
  }
  func.func @transform_0(%arg0: i32) -> (i32, i32, i32) {
    %c0_i32 = arith.constant 0 : i32
    %c0_i32_0 = arith.constant 0 : i32
    %c0_i32_1 = arith.constant 0 : i32
    return %arg0, %c0_i32, %c0_i32_0 : i32, i32, i32
  }
  func.func @transform_1(%arg0: i32) -> (i32, i32) {
    %c0_i32 = arith.constant 0 : i32
    %c0_i32_0 = arith.constant 0 : i32
    %c0_i32_1 = arith.constant 0 : i32
    return %c0_i32, %c0_i32_0 : i32, i32
  }
  func.func @transform_2(%arg0: i32) -> (i32, i32) {
    %c0_i32 = arith.constant 0 : i32
    %c0_i32_0 = arith.constant 0 : i32
    %c0_i32_1 = arith.constant 0 : i32
    return %c0_i32, %c0_i32_0 : i32, i32
  }
  func.func @transform_3(%arg0: i32) -> (i32, i32) {
    %c0_i32 = arith.constant 0 : i32
    %c0_i32_0 = arith.constant 0 : i32
    %c0_i32_1 = arith.constant 0 : i32
    return %c0_i32, %c0_i32_0 : i32, i32
  }
  func.func @transform_4(%arg0: i32) -> (i32, i32) {
    %c0_i32 = arith.constant 0 : i32
    %c0_i32_0 = arith.constant 0 : i32
    %c0_i32_1 = arith.constant 0 : i32
    return %c0_i32, %c0_i32_0 : i32, i32
  }
  func.func @transform_5(%arg0: i32) -> (i32, i32, i32) {
    %c0_i32 = arith.constant 0 : i32
    %c0_i32_0 = arith.constant 0 : i32
    %c0_i32_1 = arith.constant 0 : i32
    %c0_i32_2 = arith.constant 0 : i32
    return %c0_i32, %c0_i32_0, %c0_i32_1 : i32, i32, i32
  }
  func.func @transform_6(%arg0: i32) -> (i32, i32, i32) {
    %c0_i32 = arith.constant 0 : i32
    %c0_i32_0 = arith.constant 0 : i32
    %c0_i32_1 = arith.constant 0 : i32
    %c0_i32_2 = arith.constant 0 : i32
    return %c0_i32, %c0_i32_0, %c0_i32_1 : i32, i32, i32
  }
  func.func @transform_7(%arg0: i32) -> (i32, i32, i32) {
    %c0_i32 = arith.constant 0 : i32
    %c0_i32_0 = arith.constant 0 : i32
    %c0_i32_1 = arith.constant 0 : i32
    %c0_i32_2 = arith.constant 0 : i32
    return %c0_i32, %c0_i32_0, %c0_i32_1 : i32, i32, i32
  }
  func.func @transform_8(%arg0: i32) -> (i32, i32, i32) {
    %c0_i32 = arith.constant 0 : i32
    %c0_i32_0 = arith.constant 0 : i32
    %c0_i32_1 = arith.constant 0 : i32
    %c0_i32_2 = arith.constant 0 : i32
    return %c0_i32, %c0_i32_0, %c0_i32_1 : i32, i32, i32
  }
  func.func @transform_9(%arg0: i32) -> (i32, i32, i32) {
    %c0_i32 = arith.constant 0 : i32
    %c0_i32_0 = arith.constant 0 : i32
    %c0_i32_1 = arith.constant 0 : i32
    %c0_i32_2 = arith.constant 0 : i32
    return %c0_i32, %c0_i32_0, %c0_i32_1 : i32, i32, i32
  }
  func.func @transform_10(%arg0: i32) -> (i32, i32, i32) {
    %c0_i32 = arith.constant 0 : i32
    %c0_i32_0 = arith.constant 0 : i32
    %c0_i32_1 = arith.constant 0 : i32
    %c0_i32_2 = arith.constant 0 : i32
    return %c0_i32, %c0_i32_0, %c0_i32_1 : i32, i32, i32
  }
  func.func @transform_11(%arg0: i32) -> (i32, i32, i32) {
    %c0_i32 = arith.constant 0 : i32
    %c0_i32_0 = arith.constant 0 : i32
    %c0_i32_1 = arith.constant 0 : i32
    %c0_i32_2 = arith.constant 0 : i32
    return %c0_i32, %c0_i32_0, %c0_i32_1 : i32, i32, i32
  }
  func.func @transform_12(%arg0: i32) -> (i32, i32) {
    %c0_i32 = arith.constant 0 : i32
    %c0_i32_0 = arith.constant 0 : i32
    %c0_i32_1 = arith.constant 0 : i32
    return %c0_i32, %c0_i32_0 : i32, i32
  }
  func.func @transform_13(%arg0: i32) -> (i32, i32) {
    %c0_i32 = arith.constant 0 : i32
    %c0_i32_0 = arith.constant 0 : i32
    %c0_i32_1 = arith.constant 0 : i32
    return %c0_i32, %c0_i32_0 : i32, i32
  }
  func.func @transform_14(%arg0: i32) -> (i32, i32) {
    %c0_i32 = arith.constant 0 : i32
    %c0_i32_0 = arith.constant 0 : i32
    %c0_i32_1 = arith.constant 0 : i32
    return %c0_i32, %c0_i32_0 : i32, i32
  }
  func.func @transform_15(%arg0: i32) -> (i32, i32) {
    %c0_i32 = arith.constant 0 : i32
    %c0_i32_0 = arith.constant 0 : i32
    %c0_i32_1 = arith.constant 0 : i32
    return %c0_i32, %c0_i32_0 : i32, i32
  }
  func.func @transform_16(%arg0: i32) -> (i32, i32) {
    %c0_i32 = arith.constant 0 : i32
    %c0_i32_0 = arith.constant 0 : i32
    %c0_i32_1 = arith.constant 0 : i32
    return %c0_i32, %c0_i32_0 : i32, i32
  }
  func.func @transform_17(%arg0: i32) -> (i32, i32, i32) {
    %c0_i32 = arith.constant 0 : i32
    %c0_i32_0 = arith.constant 0 : i32
    %c0_i32_1 = arith.constant 0 : i32
    return %arg0, %c0_i32, %c0_i32_0 : i32, i32, i32
  }
}

</mosaic_0001>

<bundles_post_ra>
// kernel: tpu_custom_call.1
= control target key start
LH: loop header
LB: loop body
LE: loop exit
PB: predicated region body
PF: predicated region fallthrough
CT: control target
= control target key end

     0   :  { %s6699_s0 = inlined_call_operand.vmem [shape: f32[2,8,32], index: 0, kind: input, shape index: {}]   ;;  %s6700_s1 = inlined_call_operand.vmem [shape: f32[1,32], index: 1, kind: input, shape index: {}]   ;;  %s6701_s2 = inlined_call_operand.vmem [shape: f32[1,32], index: 2, kind: input, shape index: {}]   ;;  %s6702_s3 = inlined_call_operand.vmem [shape: f32[1,32], index: 3, kind: input, shape index: {}]   ;;  %s6703_s4 = inlined_call_operand.vmem [shape: f32[1,32], index: 4, kind: input, shape index: {}]   ;;  %s6704_s5 = inlined_call_operand.vmem [shape: f32[8,32,4], index: 5, kind: input, shape index: {}]   ;;  %s6705_s6 = inlined_call_operand.vmem [shape: f32[8,1,4], index: 6, kind: input, shape index: {}]   ;;  %s6706_s7 = inlined_call_operand.vmem [shape: f32[8,32,4], index: 7, kind: input, shape index: {}]   ;;  %s6707_s8 = inlined_call_operand.vmem [shape: f32[8,1,4], index: 8, kind: input, shape index: {}]   ;;  %s6708_s9 = inlined_call_operand.vmem [shape: f32[8,32,4], index: 9, kind: input, shape index: {}]   ;;  %s6709_s10 = inlined_call_operand.vmem [shape: f32[8,1,4], index: 10, kind: input, shape index: {}]   ;;  %s6710_s11 = inlined_call_operand.vmem [shape: f32[8,4,32], index: 11, kind: input, shape index: {}]   ;;  %s6711_s12 = inlined_call_operand.vmem [shape: f32[1,32], index: 12, kind: input, shape index: {}]   ;;  %s6712_s13 = inlined_call_operand.vmem [shape: f32[32,128], index: 13, kind: input, shape index: {}]   ;;  %s6713_s14 = inlined_call_operand.vmem [shape: f32[1,128], index: 14, kind: input, shape index: {}]   ;;  %s6714_s15 = inlined_call_operand.vmem [shape: f32[128,32], index: 15, kind: input, shape index: {}]   ;;  %s6715_s16 = inlined_call_operand.vmem [shape: f32[1,32], index: 16, kind: input, shape index: {}]   ;;  %s6716_s17 = inlined_call_operand.hbm [shape: f32[2,8,32], index: 17, kind: output, shape index: {}]  }
   0x1   :  { %6721 = sst [smem:[#allocation9_spill]] %s6699_s0 }
   0x2   :  { %6722 = sst [smem:[#allocation10_spill]] %s6700_s1 }
   0x3   :  { %6723 = sst [smem:[#allocation11_spill]] %s6701_s2 }
   0x4   :  { %6724 = sst [smem:[#allocation12_spill]] %s6702_s3 }
   0x5   :  { %22 = vsyncpa [#allocation3], 0 }
   0x6   :  { %24 = vsyncpa [#allocation3 + $0x1], 0  ;;  %s5738_s24 = smov 0   ;;  %s5740_s25 = smov 0  }
   0x7   :  { %s5742_s26 = smov 0   ;;  %s5744_s27 = smov 0  }
   0x8 LB: > { %6725 = sst [smem:[#allocation5_spill]] %s5639_s26  ;;  %s5759_s28 = sadd.s32 4294967295, %s5643_s27   ;;  %s5643_s27 = sphi %s5744_s27, %s6738_s27   ;;  %s5639_s26 = sphi %s5742_s26, %s6740_s26   ;;  %s5635_s25 = sphi %s5740_s25, %s6742_s25   ;;  %s5631_s24 = sphi %s5738_s24, %s6741_s24  }
   0x9   : > { %s4776_s29 = sadd.s32 4294967294, %s5643_s27   ;;  %s5763_s0 = sadd.s32 1, %s5643_s27  }
   0xa   : > { %6726 = sst [smem:[#allocation6_spill]] %s5763_s0  ;;  %s399_s30 = sadd.s32 1, %s5639_s26 }
   0xb   : > { %s396_s18 = ssub.s32 %s5643_s27, %s5763_s0  ;;  %p409_p0 = scmp.ne.s32.totalorder %s5639_s26, %s5635_s25 }
   0xc   : > { %p397_p1 = scmp.eq.s32.totalorder %s396_s18, 0  ;;  %p410_p2 = scmp.eq.s32.totalorder %s5759_s28, 1 }
   0xd   : > { %p415_p3 = scmp.ne.s32.totalorder %s5635_s25, %s5631_s24  ;;  %p416_p4 = scmp.eq.s32.totalorder %s4776_s29, 1 }
   0xe   : > { %s5774_s19 = scalar_select %p397_p1, %s5639_s26, %s399_s30  }
   0xf   : > { %p5776_p5 = por %p410_p2, %p409_p0  ;;  %p5780_p6 = por %p416_p4, %p415_p3 }
  0x10   : > { %6727 = sst [smem:[#allocation7_spill]] %s5774_s19  ;;  %p4779_p7 = scmp.ge.s32.totalorder %s5643_s27, 1 }
  0x11   : > { %s6729_s20 = scalar_select %p5780_p6, 1, 0 }
  0x12   : > { %p489_p8 = scmp.lt.s32.totalorder %s5643_s27, 3 }
  0x13   : > { %6730 = sst [smem:[#allocation8_spill]] %s6729_s20 }
  0x14   : > { %p490_p9 = pnand %p4779_p7, %p489_p8 }
  0x15   : > { %p540_p10 = scmp.lt.s32.totalorder (!%p490_p9), %s5759_s28, 1  ;;  %s6731_s30 = sld [smem:[#allocation9_spill]] (!%p490_p9) }
  0x16   : > { %493 = sbr.rel (%p490_p9) target bundleno = 2098 (0x832), region = 88  ;;  %s6732_s23 = sld [smem:[#allocation10_spill]] (!%p490_p9) }
  0x17   : > { %s6733_s2 = sld [smem:[#allocation11_spill]] (!%p490_p9)  ;;  %s4880_s20 = sshll.u32 (!%p490_p9), %s5759_s28, 7 }
  0x18   : > { %s6736_s3 = sld [smem:[#allocation12_spill]] (!%p490_p9) }
  0x1b   : > { %s541_s21 = scalar_select %p540_p10, %s5759_s28, 1  ;;  %vm547_vm0 = vcmask 261120   ;;  %v5645_v7 = vmov 0.0   ;;  %v579_v8 = vld [vmem:[%s6704_s5 + $0x18] sm:$0xff]  ;;  %v578_v10 = vld [vmem:[%s6704_s5 + $0x10] sm:$0xff]  ;;  %v577_v12 = vld [vmem:[%s6704_s5 + $0x8] sm:$0xff] }
  0x1c   : > { %5073 = vmatprep.subr.mxu0 %v5645_v7  ;;  %5106 = vmatprep.subr.mxu1 %v5645_v7  ;;  %v591_v9 = vld [vmem:[%s6704_s5 + $0x78] sm:$0xff]  ;;  %v590_v11 = vld [vmem:[%s6704_s5 + $0x70] sm:$0xff]  ;;  %v589_v13 = vld [vmem:[%s6704_s5 + $0x68] sm:$0xff]  ;;  %vm5646_vm1 = vmmov 0   ;;  %vm2551_vm2 = vcmask 31744   ;;  %vm3168_vm10 = vcmask 64512  }
  0x1d   : > { %s4781_s22 = sshll.u32 %s541_s21, 3  ;;  %5074 = vmatpush3.msra.mxu0 %v579_v8  ;;  %5107 = vmatpush3.msra.mxu1 %v591_v9  ;;  %v576_v14 = vld [vmem:[%s6704_s5] sm:$0xff]  ;;  %v583_v25 = vld [vmem:[%s6704_s5 + $0x38] sm:$0xff]  ;;  %v582_v27 = vld [vmem:[%s6704_s5 + $0x30] sm:$0xff]  ;;  %s537_s21 = sand.u32 1, %s5635_s25  }
  0x1e   : > { %s5791_s18 = scalar_lea.vmem %s6731_s30, %s4781_s22  ;;  %5075 = vmatprep.subr.mxu0 %v5645_v7  ;;  %5108 = vmatprep.subr.mxu1 %v5645_v7  ;;  %v588_v15 = vld [vmem:[%s6704_s5 + $0x60] sm:$0xff]  ;;  %v599_v26 = vld [vmem:[%s6704_s5 + $0xb8] sm:$0xff]  ;;  %v598_v28 = vld [vmem:[%s6704_s5 + $0xb0] sm:$0xff]  ;;  %s4780_s22 = sshll.u32 %s537_s21, 3 }
  0x1f   : > { %v544_v0 = vld [vmem:[%s5791_s18] sm:$0xff]  ;;  %5076 = vmatpush3.msra.mxu0 %v578_v10  ;;  %5109 = vmatpush3.msra.mxu1 %v590_v11  ;;  %v581_v29 = vld [vmem:[%s6704_s5 + $0x28] sm:$0xff]  ;;  %v587_v33 = vld [vmem:[%s6704_s5 + $0x58] sm:$0xff]  ;;  %s539_s26 = scalar_lea.vmem [#allocation2], %s4780_s22  ;;  %s4715_s30 = scalar_lea.hbm %s6716_s17, %s4880_s20 }
  0x20   : > { %v548_v1 = vsel %vm547_vm0, %v544_v0, 0.0  ;;  %5077 = vmatprep.subr.mxu0 %v5645_v7  ;;  %5110 = vmatprep.subr.mxu1 %v5645_v7  ;;  %v4782_v20 = vld [vmem:[%s6732_s23] ss:$0 sm:$0xff]  ;;  %v597_v30 = vld [vmem:[%s6704_s5 + $0xa8] sm:$0xff]  ;;  %v607_v34 = vld [vmem:[%s6704_s5 + $0xf8] sm:$0xff]  ;;  %s4717_s0 = sshll.u32 %s539_s26, 4  ;;  %s4718_s0 = int_to_ptr.vmem [resolvable:$true] %s4717_s0 }
  0x21   : > { %549 = vadd.xlane.f32.xlu0 %v548_v1  ;;  %5078 = vmatpush3.msra.mxu0 %v577_v12  ;;  %v4783_v22 = vld [vmem:[%s6733_s2] ss:$0 sm:$0xff]  ;;  %v586_v35 = vld [vmem:[%s6704_s5 + $0x50] sm:$0xff]  ;;  %v585_v37 = vld [vmem:[%s6704_s5 + $0x48] sm:$0xff]  ;;  %s4704_s2 = scalar_lea.sflag [#allocation3], %s537_s21  ;;  %s5647_s28 = smov [#allocation2]  }
  0x22   : > { %5111 = vmatpush3.msra.mxu1 %v589_v13  ;;  %5079 = vmatprep.subr.mxu0 %v5645_v7  ;;  %v580_v31 = vld [vmem:[%s6704_s5 + $0x20] sm:$0xff]  ;;  %v606_v36 = vld [vmem:[%s6704_s5 + $0xf0] sm:$0xff]  ;;  %v605_v38 = vld [vmem:[%s6704_s5 + $0xe8] sm:$0xff]  ;;  %s5587_s22 = sshll.u32 %s5647_s28, 4  ;;  %s5588_s22 = int_to_ptr.vmem [resolvable:$false] %s5587_s22 }
  0x23   : > { %5112 = vmatprep.subr.mxu1 %v5645_v7  ;;  %5080 = vmatpush3.msra.mxu0 %v576_v14  ;;  %v596_v32 = vld [vmem:[%s6704_s5 + $0xa0] sm:$0xff]  ;;  %v595_v41 = vld [vmem:[%s6704_s5 + $0x98] sm:$0xff]  ;;  %v594_v43 = vld [vmem:[%s6704_s5 + $0x90] sm:$0xff]  ;;  %s5589_s23 = scalar_lea.vmem %s5588_s22, 256  ;;  %p5590_p0 = scmp.lt.s32.totalorder %s4718_s0, %s5588_s22 }
  0x24   : > { %5113 = vmatpush3.msra.mxu1 %v588_v15  ;;  %5081 = vmatprep.mubr.msk.f32.mxu0 %vm5646_vm1, %v5645_v7  ;;  %v584_v39 = vld [vmem:[%s6704_s5 + $0x40] sm:$0xff]  ;;  %v1234_v42 = vld [vmem:[%s6706_s7 + $0x38] sm:$0xff]  ;;  %v1233_v44 = vld [vmem:[%s6706_s7 + $0x30] sm:$0xff] }
  0x25   : > { %5084 = vmatprep.subr.mxu0 %v5645_v7  ;;  %5114 = vmatprep.mubr.msk.f32.mxu1 %vm5646_vm1, %v5645_v7  ;;  %v604_v40 = vld [vmem:[%s6704_s5 + $0xe0] sm:$0xff]  ;;  %v593_v45 = vld [vmem:[%s6704_s5 + $0x88] sm:$0xff]  ;;  %v603_v49 = vld [vmem:[%s6704_s5 + $0xd8] sm:$0xff] }
  0x26   : > { %5128 = vmatprep.subr.mxu1 %v5645_v7  ;;  %v1232_v46 = vld [vmem:[%s6706_s7 + $0x28] sm:$0xff]  ;;  %v592_v47 = vld [vmem:[%s6704_s5 + $0x80] sm:$0xff]  ;;  %v1242_v50 = vld [vmem:[%s6706_s7 + $0x78] sm:$0xff] }
  0x27   : > { %v1231_v48 = vld [vmem:[%s6706_s7 + $0x20] sm:$0xff]  ;;  %v602_v51 = vld [vmem:[%s6704_s5 + $0xd0] sm:$0xff]  ;;  %v601_v53 = vld [vmem:[%s6704_s5 + $0xc8] sm:$0xff] }
  0x28   : > { %v1241_v52 = vld [vmem:[%s6706_s7 + $0x70] sm:$0xff]  ;;  %v1240_v54 = vld [vmem:[%s6706_s7 + $0x68] sm:$0xff]  ;;  %v600_v55 = vld [vmem:[%s6704_s5 + $0xc0] sm:$0xff] }
  0x29   : > { %v1239_v56 = vld [vmem:[%s6706_s7 + $0x60] sm:$0xff]  ;;  %v1230_v57 = vld [vmem:[%s6706_s7 + $0x18] sm:$0xff]  ;;  %v1229_v59 = vld [vmem:[%s6706_s7 + $0x10] sm:$0xff] }
  0x2a   : > { %v1250_v58 = vld [vmem:[%s6706_s7 + $0xb8] sm:$0xff]  ;;  %v1249_v60 = vld [vmem:[%s6706_s7 + $0xb0] sm:$0xff]  ;;  %v1228_v61 = vld [vmem:[%s6706_s7 + $0x8] sm:$0xff] }
  0x2b   : > { %v1248_v62 = vld [vmem:[%s6706_s7 + $0xa8] sm:$0xff]  ;;  %v1227_v63 = vld [vmem:[%s6706_s7] sm:$0xff]  ;;  %v1238_v1 = vld [vmem:[%s6706_s7 + $0x58] sm:$0xff] }
  0x2c   : > { %v1235_v8 = vld [vmem:[%s6706_s7 + $0x40] sm:$0xff]  ;;  %v1246_v10 = vld [vmem:[%s6706_s7 + $0x98] sm:$0xff]  ;;  %v1245_v12 = vld [vmem:[%s6706_s7 + $0x90] sm:$0xff] }
  0x2d   : > { %v1255_v9 = vld [vmem:[%s6706_s7 + $0xe0] sm:$0xff]  ;;  %v1882_v11 = vld [vmem:[%s6708_s9 + $0x38] sm:$0xff]  ;;  %v1881_v13 = vld [vmem:[%s6708_s9 + $0x30] sm:$0xff] }
  0x2e   : > { %v1244_v14 = vld [vmem:[%s6706_s7 + $0x88] sm:$0xff] }
  0x2f   : > { %v1880_v15 = vld [vmem:[%s6708_s9 + $0x28] sm:$0xff] }
  0xaa   : > { %v550_v2 = vpop.xlane.xlu0 %549 }
  0xab   : > { %v552_v3 = vmul.f32 0.03125, %v550_v2  ;;  %v1258_v2 = vld [vmem:[%s6706_s7 + $0xf8] sm:$0xff] }
  0xad   : > { %v553_v4 = vsub.f32 %v544_v0, %v552_v3  ;;  %v1247_v0 = vld [vmem:[%s6706_s7 + $0xa0] sm:$0xff]  ;;  %v1237_v3 = vld [vmem:[%s6706_s7 + $0x50] sm:$0xff] }
  0xaf   : > { %v554_v5 = vmul.f32 %v553_v4, %v553_v4 }
  0xb1   : > { %v555_v6 = vsel %vm547_vm0, %v554_v5, 0.0  ;;  %v1236_v5 = vld [vmem:[%s6706_s7 + $0x48] sm:$0xff] }
  0xb2   : > { %556 = vadd.xlane.f32.xlu0 %v555_v6  ;;  %v1256_v6 = vld [vmem:[%s6706_s7 + $0xe8] sm:$0xff] }
 0x13b   : > { %v557_v16 = vpop.xlane.xlu0 %556 }
 0x13c   : > { %v558_v17 = vmul.f32 0.03125, %v557_v16  ;;  %v1243_v16 = vld [vmem:[%s6706_s7 + $0x80] sm:$0xff] }
 0x13e   : > { %v559_v18 = vadd.f32 1e-05, %v558_v17  ;;  %v1879_v17 = vld [vmem:[%s6708_s9 + $0x20] sm:$0xff] }
 0x140   : > { %5544 = vrsqrt.f32 %v559_v18  ;;  %v1254_v18 = vld [vmem:[%s6706_s7 + $0xd8] sm:$0xff] }
 0x14d   : > { %v5545_v19 = vpop.eup %5544 }
 0x14e   : > { %v561_v21 = vmul.f32 %v5545_v19, %v553_v4  ;;  %v1257_v4 = vld [vmem:[%s6706_s7 + $0xf0] sm:$0xff]  ;;  %v1890_v19 = vld [vmem:[%s6708_s9 + $0x78] sm:$0xff] }
 0x150   : > { %v568_v23 = vmul.f32 %v4782_v20, %v561_v21  ;;  %v1253_v20 = vld [vmem:[%s6706_s7 + $0xd0] sm:$0xff] }
 0x151   : > { %v1889_v21 = vld [vmem:[%s6708_s9 + $0x70] sm:$0xff] }
 0x152   : > { %v5840_v24 = vadd.f32 %v4783_v22, %v568_v23  ;;  %v1252_v22 = vld [vmem:[%s6706_s7 + $0xc8] sm:$0xff] }
 0x153   : > { %v1888_v23 = vld [vmem:[%s6708_s9 + $0x68] sm:$0xff] }
 0x154   : > { %5082 = vmatmul.mubr.msk.f32.vlgmr.msra.gmra.mxu0 %vm547_vm0, %v5840_v24  ;;  %5115 = vmatmul.mubr.msk.f32.vlgmr.msra.gmra.mxu1 %vm547_vm0, %v5840_v24 }
 0x155   : > { %5085 = vmatpush3.msra.mxu0 %v583_v25  ;;  %5129 = vmatpush3.msra.mxu1 %v599_v26  ;;  %v1251_v25 = vld [vmem:[%s6706_s7 + $0xc0] sm:$0xff] }
 0x156   : > { %5086 = vmatprep.subr.mxu0 %v5645_v7  ;;  %5130 = vmatprep.subr.mxu1 %v5645_v7  ;;  %v1887_v26 = vld [vmem:[%s6708_s9 + $0x60] sm:$0xff] }
 0x157   : > { %5087 = vmatpush3.msra.mxu0 %v582_v27  ;;  %5131 = vmatpush3.msra.mxu1 %v598_v28  ;;  %v1878_v27 = vld [vmem:[%s6708_s9 + $0x18] sm:$0xff] }
 0x158   : > { %5088 = vmatprep.subr.mxu0 %v5645_v7  ;;  %5132 = vmatprep.subr.mxu1 %v5645_v7  ;;  %v1898_v28 = vld [vmem:[%s6708_s9 + $0xb8] sm:$0xff] }
 0x159   : > { %5089 = vmatpush3.msra.mxu0 %v581_v29  ;;  %5133 = vmatpush3.msra.mxu1 %v597_v30  ;;  %v1877_v29 = vld [vmem:[%s6708_s9 + $0x10] sm:$0xff] }
 0x15a   : > { %5090 = vmatprep.subr.mxu0 %v5645_v7  ;;  %5134 = vmatprep.subr.mxu1 %v5645_v7  ;;  %v1897_v30 = vld [vmem:[%s6708_s9 + $0xb0] sm:$0xff] }
 0x15b   : > { %5091 = vmatpush3.msra.mxu0 %v580_v31  ;;  %5092 = vmatprep.mubr.msk.f32.mxu0 %vm5646_vm1, %v5645_v7  ;;  %v1876_v31 = vld [vmem:[%s6708_s9 + $0x8] sm:$0xff] }
 0x15c   : > { %5135 = vmatpush3.msra.mxu1 %v596_v32  ;;  %5136 = vmatprep.mubr.msk.f32.mxu1 %vm5646_vm1, %v5645_v7  ;;  %v1896_v32 = vld [vmem:[%s6708_s9 + $0xa8] sm:$0xff] }
 0x15d   : > { %5093 = vmatmul.mubr.msk.f32.vlgmr.msra.gmra.mxu0 %vm547_vm0, %v5840_v24  ;;  %5095 = vmatprep.subr.mxu0 %v5645_v7 }
 0x15e   : > { %5137 = vmatmul.mubr.msk.f32.vlgmr.msra.gmra.mxu1 %vm547_vm0, %v5840_v24  ;;  %5150 = vmatprep.subr.mxu1 %v5645_v7 }
 0x15f   : > { %5096 = vmatpush3.msra.mxu0 %v587_v33  ;;  %5151 = vmatpush3.msra.mxu1 %v607_v34  ;;  %v1875_v33 = vld [vmem:[%s6708_s9] sm:$0xff] }
 0x160   : > { %5097 = vmatprep.subr.mxu0 %v5645_v7  ;;  %5152 = vmatprep.subr.mxu1 %v5645_v7  ;;  %v1895_v34 = vld [vmem:[%s6708_s9 + $0xa0] sm:$0xff] }
 0x161   : > { %5098 = vmatpush3.msra.mxu0 %v586_v35  ;;  %5153 = vmatpush3.msra.mxu1 %v606_v36  ;;  %v1886_v35 = vld [vmem:[%s6708_s9 + $0x58] sm:$0xff] }
 0x162   : > { %5099 = vmatprep.subr.mxu0 %v5645_v7  ;;  %5154 = vmatprep.subr.mxu1 %v5645_v7  ;;  %v1906_v36 = vld [vmem:[%s6708_s9 + $0xf8] sm:$0xff] }
 0x163   : > { %5100 = vmatpush3.msra.mxu0 %v585_v37  ;;  %5155 = vmatpush3.msra.mxu1 %v605_v38  ;;  %v1885_v37 = vld [vmem:[%s6708_s9 + $0x50] sm:$0xff] }
 0x164   : > { %5101 = vmatprep.subr.mxu0 %v5645_v7  ;;  %5156 = vmatprep.subr.mxu1 %v5645_v7  ;;  %v1905_v38 = vld [vmem:[%s6708_s9 + $0xf0] sm:$0xff] }
 0x165   : > { %5102 = vmatpush3.msra.mxu0 %v584_v39  ;;  %5103 = vmatprep.mubr.msk.f32.mxu0 %vm5646_vm1, %v5645_v7  ;;  %v1884_v39 = vld [vmem:[%s6708_s9 + $0x48] sm:$0xff] }
 0x166   : > { %5157 = vmatpush3.msra.mxu1 %v604_v40  ;;  %5158 = vmatprep.mubr.msk.f32.mxu1 %vm5646_vm1, %v5645_v7  ;;  %v1904_v40 = vld [vmem:[%s6708_s9 + $0xe8] sm:$0xff] }
 0x167   : > { %5104 = vmatmul.mubr.msk.f32.vlgmr.msra.gmra.mxu0 %vm547_vm0, %v5840_v24  ;;  %5117 = vmatprep.subr.mxu0 %v5645_v7 }
 0x168   : > { %5159 = vmatmul.mubr.msk.f32.vlgmr.msra.gmra.mxu1 %vm547_vm0, %v5840_v24  ;;  %5172 = vmatprep.subr.mxu1 %v5645_v7 }
 0x169   : > { %5118 = vmatpush3.msra.mxu0 %v595_v41  ;;  %5173 = vmatpush3.msra.mxu1 %v1234_v42  ;;  %v1883_v41 = vld [vmem:[%s6708_s9 + $0x40] sm:$0xff] }
 0x16a   : > { %5119 = vmatprep.subr.mxu0 %v5645_v7  ;;  %5174 = vmatprep.subr.mxu1 %v5645_v7  ;;  %v1903_v42 = vld [vmem:[%s6708_s9 + $0xe0] sm:$0xff] }
 0x16b   : > { %5120 = vmatpush3.msra.mxu0 %v594_v43  ;;  %5175 = vmatpush3.msra.mxu1 %v1233_v44  ;;  %v1894_v43 = vld [vmem:[%s6708_s9 + $0x98] sm:$0xff]  ;;  %v1893_v44 = vld [vmem:[%s6708_s9 + $0x90] sm:$0xff] }
 0x16c   : > { %5121 = vmatprep.subr.mxu0 %v5645_v7  ;;  %5176 = vmatprep.subr.mxu1 %v5645_v7 }
 0x16d   : > { %5122 = vmatpush3.msra.mxu0 %v593_v45  ;;  %5177 = vmatpush3.msra.mxu1 %v1232_v46  ;;  %v1892_v45 = vld [vmem:[%s6708_s9 + $0x88] sm:$0xff]  ;;  %v1891_v46 = vld [vmem:[%s6708_s9 + $0x80] sm:$0xff] }
 0x16e   : > { %5123 = vmatprep.subr.mxu0 %v5645_v7  ;;  %5178 = vmatprep.subr.mxu1 %v5645_v7 }
 0x16f   : > { %5124 = vmatpush3.msra.mxu0 %v592_v47  ;;  %5125 = vmatprep.mubr.msk.f32.mxu0 %vm5646_vm1, %v5645_v7  ;;  %v1902_v47 = vld [vmem:[%s6708_s9 + $0xd8] sm:$0xff] }
 0x170   : > { %5179 = vmatpush3.msra.mxu1 %v1231_v48  ;;  %5180 = vmatprep.mubr.msk.f32.mxu1 %vm5646_vm1, %v5645_v7  ;;  %v1901_v48 = vld [vmem:[%s6708_s9 + $0xd0] sm:$0xff] }
 0x171   : > { %5126 = vmatmul.mubr.msk.f32.vlgmr.msra.gmra.mxu0 %vm547_vm0, %v5840_v24  ;;  %5139 = vmatprep.subr.mxu0 %v5645_v7 }
 0x172   : > { %5181 = vmatmul.mubr.msk.f32.vlgmr.msra.gmra.mxu1 %vm547_vm0, %v5840_v24  ;;  %5194 = vmatprep.subr.mxu1 %v5645_v7 }
 0x173   : > { %5140 = vmatpush3.msra.mxu0 %v603_v49  ;;  %5195 = vmatpush3.msra.mxu1 %v1242_v50  ;;  %v1900_v49 = vld [vmem:[%s6708_s9 + $0xc8] sm:$0xff]  ;;  %v1899_v50 = vld [vmem:[%s6708_s9 + $0xc0] sm:$0xff] }
 0x174   : > { %5141 = vmatprep.subr.mxu0 %v5645_v7  ;;  %5196 = vmatprep.subr.mxu1 %v5645_v7 }
 0x175   : > { %5142 = vmatpush3.msra.mxu0 %v602_v51  ;;  %5197 = vmatpush3.msra.mxu1 %v1241_v52 }
 0x176   : > { %5143 = vmatprep.subr.mxu0 %v5645_v7  ;;  %5198 = vmatprep.subr.mxu1 %v5645_v7 }
 0x177   : > { %5144 = vmatpush3.msra.mxu0 %v601_v53  ;;  %5199 = vmatpush3.msra.mxu1 %v1240_v54 }
 0x178   : > { %5145 = vmatprep.subr.mxu0 %v5645_v7  ;;  %5200 = vmatprep.subr.mxu1 %v5645_v7 }
 0x179   : > { %5146 = vmatpush3.msra.mxu0 %v600_v55  ;;  %5147 = vmatprep.mubr.msk.f32.mxu0 %vm5646_vm1, %v5645_v7 }
 0x17a   : > { %5201 = vmatpush3.msra.mxu1 %v1239_v56  ;;  %5202 = vmatprep.mubr.msk.f32.mxu1 %vm5646_vm1, %v5645_v7 }
 0x17b   : > { %5148 = vmatmul.mubr.msk.f32.vlgmr.msra.gmra.mxu0 %vm547_vm0, %v5840_v24  ;;  %5161 = vmatprep.subr.mxu0 %v5645_v7 }
 0x17c   : > { %5203 = vmatmul.mubr.msk.f32.vlgmr.msra.gmra.mxu1 %vm547_vm0, %v5840_v24  ;;  %5216 = vmatprep.subr.mxu1 %v5645_v7 }
 0x17d   : > { %5162 = vmatpush3.msra.mxu0 %v1230_v57  ;;  %5217 = vmatpush3.msra.mxu1 %v1250_v58 }
 0x17e   : > { %5163 = vmatprep.subr.mxu0 %v5645_v7  ;;  %5218 = vmatprep.subr.mxu1 %v5645_v7 }
 0x17f   : > { %5164 = vmatpush3.msra.mxu0 %v1229_v59  ;;  %5219 = vmatpush3.msra.mxu1 %v1249_v60 }
 0x180   : > { %5165 = vmatprep.subr.mxu0 %v5645_v7  ;;  %5220 = vmatprep.subr.mxu1 %v5645_v7 }
 0x181   : > { %5166 = vmatpush3.msra.mxu0 %v1228_v61  ;;  %5221 = vmatpush3.msra.mxu1 %v1248_v62 }
 0x182   : > { %5167 = vmatprep.subr.mxu0 %v5645_v7  ;;  %5222 = vmatprep.subr.mxu1 %v5645_v7 }
 0x183   : > { %5168 = vmatpush3.msra.mxu0 %v1227_v63  ;;  %5169 = vmatprep.mubr.msk.f32.mxu0 %vm5646_vm1, %v5645_v7 }
 0x184   : > { %5223 = vmatpush3.msra.mxu1 %v1247_v0  ;;  %5224 = vmatprep.mubr.msk.f32.mxu1 %vm5646_vm1, %v5645_v7 }
 0x185   : > { %5170 = vmatmul.mubr.msk.f32.vlgmr.msra.gmra.mxu0 %vm547_vm0, %v5840_v24  ;;  %5183 = vmatprep.subr.mxu0 %v5645_v7 }
 0x186   : > { %5225 = vmatmul.mubr.msk.f32.vlgmr.msra.gmra.mxu1 %vm547_vm0, %v5840_v24  ;;  %5238 = vmatprep.subr.mxu1 %v5645_v7 }
 0x187   : > { %5184 = vmatpush3.msra.mxu0 %v1238_v1  ;;  %5239 = vmatpush3.msra.mxu1 %v1258_v2  ;;  %v4803_v2 = vld [vmem:[%s6707_s8 + $0x3] ss:$0 sm:$0xff] }
 0x188   : > { %5185 = vmatprep.subr.mxu0 %v5645_v7  ;;  %5240 = vmatprep.subr.mxu1 %v5645_v7 }
 0x189   : > { %5186 = vmatpush3.msra.mxu0 %v1237_v3  ;;  %5241 = vmatpush3.msra.mxu1 %v1257_v4 }
 0x18a   : > { %5187 = vmatprep.subr.mxu0 %v5645_v7  ;;  %5242 = vmatprep.subr.mxu1 %v5645_v7 }
 0x18b   : > { %5188 = vmatpush3.msra.mxu0 %v1236_v5  ;;  %5243 = vmatpush3.msra.mxu1 %v1256_v6  ;;  %v4787_v5 = vld [vmem:[%s6705_s6 + $0x3] ss:$0 sm:$0xff] }
 0x18c   : > { %5189 = vmatprep.subr.mxu0 %v5645_v7  ;;  %5244 = vmatprep.subr.mxu1 %v5645_v7 }
 0x18d   : > { %5190 = vmatpush3.msra.mxu0 %v1235_v8  ;;  %5191 = vmatprep.mubr.msk.f32.mxu0 %vm5646_vm1, %v5645_v7 }
 0x18e   : > { %5245 = vmatpush3.msra.mxu1 %v1255_v9  ;;  %5246 = vmatprep.mubr.msk.f32.mxu1 %vm5646_vm1, %v5645_v7 }
 0x18f   : > { %5192 = vmatmul.mubr.msk.f32.vlgmr.msra.gmra.mxu0 %vm547_vm0, %v5840_v24  ;;  %5205 = vmatprep.subr.mxu0 %v5645_v7 }
 0x190   : > { %5247 = vmatmul.mubr.msk.f32.vlgmr.msra.gmra.mxu1 %vm547_vm0, %v5840_v24  ;;  %5260 = vmatprep.subr.mxu1 %v5645_v7 }
 0x191   : > { %5206 = vmatpush3.msra.mxu0 %v1246_v10  ;;  %5261 = vmatpush3.msra.mxu1 %v1882_v11  ;;  %v4800_v11 = vld [vmem:[%s6707_s8] ss:$0 sm:$0xff] }
 0x192   : > { %5207 = vmatprep.subr.mxu0 %v5645_v7  ;;  %5262 = vmatprep.subr.mxu1 %v5645_v7 }
 0x193   : > { %5208 = vmatpush3.msra.mxu0 %v1245_v12  ;;  %5263 = vmatpush3.msra.mxu1 %v1881_v13  ;;  %v4805_v12 = vld [vmem:[%s6707_s8 + $0x5] ss:$0 sm:$0xff] }
 0x194   : > { %5209 = vmatprep.subr.mxu0 %v5645_v7  ;;  %5264 = vmatprep.subr.mxu1 %v5645_v7 }
 0x195   : > { %5210 = vmatpush3.msra.mxu0 %v1244_v14  ;;  %5265 = vmatpush3.msra.mxu1 %v1880_v15  ;;  %v4784_v14 = vld [vmem:[%s6705_s6] ss:$0 sm:$0xff] }
 0x196   : > { %5211 = vmatprep.subr.mxu0 %v5645_v7  ;;  %5266 = vmatprep.subr.mxu1 %v5645_v7 }
 0x197   : > { %5212 = vmatpush3.msra.mxu0 %v1243_v16  ;;  %5213 = vmatprep.mubr.msk.f32.mxu0 %vm5646_vm1, %v5645_v7 }
 0x198   : > { %5267 = vmatpush3.msra.mxu1 %v1879_v17  ;;  %5268 = vmatprep.mubr.msk.f32.mxu1 %vm5646_vm1, %v5645_v7  ;;  %v4789_v17 = vld [vmem:[%s6705_s6 + $0x5] ss:$0 sm:$0xff] }
 0x199   : > { %5214 = vmatmul.mubr.msk.f32.vlgmr.msra.gmra.mxu0 %vm547_vm0, %v5840_v24  ;;  %5227 = vmatprep.subr.mxu0 %v5645_v7 }
 0x19a   : > { %5269 = vmatmul.mubr.msk.f32.vlgmr.msra.gmra.mxu1 %vm547_vm0, %v5840_v24  ;;  %5282 = vmatprep.subr.mxu1 %v5645_v7 }
 0x19b   : > { %5228 = vmatpush3.msra.mxu0 %v1254_v18  ;;  %5283 = vmatpush3.msra.mxu1 %v1890_v19  ;;  %v4801_v18 = vld [vmem:[%s6707_s8 + $0x1] ss:$0 sm:$0xff] }
 0x19c   : > { %5229 = vmatprep.subr.mxu0 %v5645_v7  ;;  %5284 = vmatprep.subr.mxu1 %v5645_v7 }
 0x19d   : > { %5230 = vmatpush3.msra.mxu0 %v1253_v20  ;;  %5285 = vmatpush3.msra.mxu1 %v1889_v21 }
 0x19e   : > { %5231 = vmatprep.subr.mxu0 %v5645_v7  ;;  %5286 = vmatprep.subr.mxu1 %v5645_v7 }
 0x19f   : > { %5232 = vmatpush3.msra.mxu0 %v1252_v22  ;;  %5287 = vmatpush3.msra.mxu1 %v1888_v23  ;;  %v4785_v23 = vld [vmem:[%s6705_s6 + $0x1] ss:$0 sm:$0xff] }
 0x1a0   : > { %5233 = vmatprep.subr.mxu0 %v5645_v7  ;;  %5288 = vmatprep.subr.mxu1 %v5645_v7 }
 0x1a1   : > { %5234 = vmatpush3.msra.mxu0 %v1251_v25  ;;  %5235 = vmatprep.mubr.msk.f32.mxu0 %vm5646_vm1, %v5645_v7 }
 0x1a2   : > { %5289 = vmatpush3.msra.mxu1 %v1887_v26  ;;  %5290 = vmatprep.mubr.msk.f32.mxu1 %vm5646_vm1, %v5645_v7 }
 0x1a3   : > { %5236 = vmatmul.mubr.msk.f32.vlgmr.msra.gmra.mxu0 %vm547_vm0, %v5840_v24  ;;  %5249 = vmatprep.subr.mxu0 %v5645_v7 }
 0x1a4   : > { %5291 = vmatmul.mubr.msk.f32.vlgmr.msra.gmra.mxu1 %vm547_vm0, %v5840_v24  ;;  %5304 = vmatprep.subr.mxu1 %v5645_v7 }
 0x1a5   : > { %5250 = vmatpush3.msra.mxu0 %v1878_v27  ;;  %5305 = vmatpush3.msra.mxu1 %v1898_v28  ;;  %v4802_v28 = vld [vmem:[%s6707_s8 + $0x2] ss:$0 sm:$0xff] }
 0x1a6   : > { %5251 = vmatprep.subr.mxu0 %v5645_v7  ;;  %5306 = vmatprep.subr.mxu1 %v5645_v7 }
 0x1a7   : > { %5252 = vmatpush3.msra.mxu0 %v1877_v29  ;;  %5307 = vmatpush3.msra.mxu1 %v1897_v30  ;;  %v4807_v29 = vld [vmem:[%s6707_s8 + $0x7] ss:$0 sm:$0xff] }
 0x1a8   : > { %5253 = vmatprep.subr.mxu0 %v5645_v7  ;;  %5308 = vmatprep.subr.mxu1 %v5645_v7 }
 0x1a9   : > { %5254 = vmatpush3.msra.mxu0 %v1876_v31  ;;  %5309 = vmatpush3.msra.mxu1 %v1896_v32  ;;  %v4786_v31 = vld [vmem:[%s6705_s6 + $0x2] ss:$0 sm:$0xff] }
 0x1aa   : > { %5255 = vmatprep.subr.mxu0 %v5645_v7  ;;  %5310 = vmatprep.subr.mxu1 %v5645_v7 }
 0x1ab   : > { %5256 = vmatpush3.msra.mxu0 %v1875_v33  ;;  %5257 = vmatprep.mubr.msk.f32.mxu0 %vm5646_vm1, %v5645_v7 }
 0x1ac   : > { %5311 = vmatpush3.msra.mxu1 %v1895_v34  ;;  %5312 = vmatprep.mubr.msk.f32.mxu1 %vm5646_vm1, %v5645_v7  ;;  %v4791_v34 = vld [vmem:[%s6705_s6 + $0x7] ss:$0 sm:$0xff] }
 0x1ad   : > { %5258 = vmatmul.mubr.msk.f32.vlgmr.msra.gmra.mxu0 %vm547_vm0, %v5840_v24  ;;  %5271 = vmatprep.subr.mxu0 %v5645_v7 }
 0x1ae   : > { %5313 = vmatmul.mubr.msk.f32.vlgmr.msra.gmra.mxu1 %vm547_vm0, %v5840_v24  ;;  %5326 = vmatprep.subr.mxu1 %v5645_v7 }
 0x1af   : > { %5272 = vmatpush3.msra.mxu0 %v1886_v35  ;;  %5327 = vmatpush3.msra.mxu1 %v1906_v36 }
 0x1b0   : > { %5273 = vmatprep.subr.mxu0 %v5645_v7  ;;  %5328 = vmatprep.subr.mxu1 %v5645_v7 }
 0x1b1   : > { %5274 = vmatpush3.msra.mxu0 %v1885_v37  ;;  %5329 = vmatpush3.msra.mxu1 %v1905_v38 }
 0x1b2   : > { %5275 = vmatprep.subr.mxu0 %v5645_v7  ;;  %5330 = vmatprep.subr.mxu1 %v5645_v7 }
 0x1b3   : > { %5276 = vmatpush3.msra.mxu0 %v1884_v39  ;;  %5331 = vmatpush3.msra.mxu1 %v1904_v40  ;;  %v4804_v40 = vld [vmem:[%s6707_s8 + $0x4] ss:$0 sm:$0xff] }
 0x1b4   : > { %5277 = vmatprep.subr.mxu0 %v5645_v7  ;;  %5332 = vmatprep.subr.mxu1 %v5645_v7 }
 0x1b5   : > { %5278 = vmatpush3.msra.mxu0 %v1883_v41  ;;  %5279 = vmatprep.mubr.msk.f32.mxu0 %vm5646_vm1, %v5645_v7  ;;  %v4817_v41 = vld [vmem:[%s6709_s10 + $0x1] ss:$0 sm:$0xff] }
 0x1b6   : > { %5333 = vmatpush3.msra.mxu1 %v1903_v42  ;;  %5334 = vmatprep.mubr.msk.f32.mxu1 %vm5646_vm1, %v5645_v7 }
 0x1b7   : > { %5280 = vmatmul.mubr.msk.f32.vlgmr.msra.gmra.mxu0 %vm547_vm0, %v5840_v24  ;;  %5293 = vmatprep.subr.mxu0 %v5645_v7 }
 0x1b8   : > { %5335 = vmatmul.mubr.msk.f32.vlgmr.msra.gmra.mxu1 %vm547_vm0, %v5840_v24  ;;  %5294 = vmatpush3.msra.mxu0 %v1894_v43  ;;  %v4788_v43 = vld [vmem:[%s6705_s6 + $0x4] ss:$0 sm:$0xff] }
 0x1b9   : > { %5295 = vmatprep.subr.mxu0 %v5645_v7  ;;  %5301 = vmatprep.mubr.msk.f32.mxu0 %vm5646_vm1, %v5645_v7 }
 0x1ba   : > { %5296 = vmatpush3.msra.mxu0 %v1893_v44  ;;  %5352 = vmatprep.subr.mxu1 %v5645_v7 }
 0x1bb   : > { %5297 = vmatprep.subr.mxu0 %v5645_v7  ;;  %5354 = vmatprep.mubr.msk.f32.mxu1 %vm5646_vm1, %v5645_v7 }
 0x1bc   : > { %5298 = vmatpush3.msra.mxu0 %v1892_v45 }
 0x1bd   : > { %5299 = vmatprep.subr.mxu0 %v5645_v7 }
 0x1be   : > { %5300 = vmatpush3.msra.mxu0 %v1891_v46 }
 0x1bf   : > { %5302 = vmatmul.mubr.msk.f32.vlgmr.msra.gmra.mxu0 %vm547_vm0, %v5840_v24  ;;  %5315 = vmatprep.subr.mxu0 %v5645_v7 }
 0x1c0   : > { %5316 = vmatpush3.msra.mxu0 %v1902_v47  ;;  %5323 = vmatprep.mubr.msk.f32.mxu0 %vm5646_vm1, %v5645_v7 }
 0x1c1   : > { %5317 = vmatprep.subr.mxu0 %v5645_v7 }
 0x1c2   : > { %5318 = vmatpush3.msra.mxu0 %v1901_v48 }
 0x1c3   : > { %5319 = vmatprep.subr.mxu0 %v5645_v7 }
 0x1c4   : > { %5320 = vmatpush3.msra.mxu0 %v1900_v49 }
 0x1c5   : > { %5321 = vmatprep.subr.mxu0 %v5645_v7 }
 0x1c6   : > { %5322 = vmatpush3.msra.mxu0 %v1899_v50  ;;  %v4806_v50 = vld [vmem:[%s6707_s8 + $0x6] ss:$0 sm:$0xff] }
 0x1c7   : > { %5324 = vmatmul.mubr.msk.f32.vlgmr.msra.gmra.mxu0 %vm547_vm0, %v5840_v24  ;;  %5337 = vmatprep.subr.mxu0 %v5645_v7 }
 0x1c8   : > { %5339 = vmatprep.mubr.msk.f32.mxu0 %vm5646_vm1, %v5645_v7 }
 0x214   : > { %v733_v51 = vpop.f32.mrf.mxu0  ;;  %v943_v52 = vpop.f32.mrf.mxu1 }
 0x215   : > { %v944_v10 = vadd.f32 %v4787_v5, %v943_v52  ;;  %v734_v22 = vadd.f32 %v4784_v14, %v733_v51  ;;  %v4790_v52 = vld [vmem:[%s6705_s6 + $0x6] ss:$0 sm:$0xff] }
 0x216   : > { %v5083_v53 = vpop.f32.mrf.mxu0  ;;  %v5116_v54 = vpop.f32.mrf.mxu1 }
 0x21d   : > { %v803_v55 = vpop.f32.mrf.mxu0 }
 0x21e   : > { %v1083_v56 = vpop.f32.mrf.mxu1  ;;  %v804_v27 = vadd.f32 %v4785_v23, %v803_v55 }
 0x21f   : > { %v5094_v57 = vpop.f32.mrf.mxu0  ;;  %v1084_v25 = vadd.f32 %v4789_v17, %v1083_v56 }
 0x220   : > { %v5138_v58 = vpop.f32.mrf.mxu1 }
 0x221   : > { %v4816_v58 = vld [vmem:[%s6709_s10] ss:$0 sm:$0xff] }
 0x227   : > { %v873_v59 = vpop.f32.mrf.mxu0 }
 0x228   : > { %v1223_v60 = vpop.f32.mrf.mxu1  ;;  %v874_v38 = vadd.f32 %v4786_v31, %v873_v59 }
 0x229   : > { %v5105_v61 = vpop.f32.mrf.mxu0  ;;  %v1224_v39 = vadd.f32 %v4791_v34, %v1223_v60 }
 0x22a   : > { %v5160_v62 = vpop.f32.mrf.mxu1 }
 0x231   : > { %v6290_v63 = vpop.f32.mrf.mxu0 }
 0x232   : > { %v1451_v24 = vpop.f32.mrf.mxu1  ;;  %v1014_v49 = vadd.f32 %v4788_v43, %v6290_v63 }
 0x233   : > { %v5127_v0 = vpop.f32.mrf.mxu0  ;;  %v1452_v26 = vadd.f32 %v4801_v18, %v1451_v24 }
 0x234   : > { %v5182_v1 = vpop.f32.mrf.mxu1 }
 0x23b   : > { %v6295_v3 = vpop.f32.mrf.mxu0 }
 0x23c   : > { %v1591_v4 = vpop.f32.mrf.mxu1  ;;  %v1154_v57 = vadd.f32 %v4790_v52, %v6295_v3 }
 0x23d   : > { %v1592_v6 = vadd.f32 %v4803_v2, %v1591_v4  ;;  %v5149_v8 = vpop.f32.mrf.mxu0 }
 0x23e   : > { %v5204_v9 = vpop.f32.mrf.mxu1  ;;  %v2523_v8 = vlaneseq }
 0x23f   : > { %5353 = vmatpush3.xpose.msk.msra.mxu1 %vm2551_vm2, %v1592_v6 }
 0x240   : > { %5362 = vmatprep.subr.mxu1 %v5645_v7  ;;  %v2524_v9 = vshrl.u32 %v2523_v8, 7 }
 0x242   : > { %5355 = vmatmul.mubr.msk.f32.vlgmr.msra.gmra.mxu1 %vm2551_vm2, %v944_v10  ;;  %v2526_v10 = vand.u32 127, %v2523_v8 }
 0x243   : > { %5364 = vmatprep.mubr.msk.f32.mxu1 %vm5646_vm1, %v5645_v7 }
 0x245   : > { %v1381_v13 = vpop.f32.mrf.mxu0 }
 0x246   : > { %v1382_v15 = vadd.f32 %v4800_v11, %v1381_v13  ;;  %v1731_v16 = vpop.f32.mrf.mxu1  ;;  %v2527_v11 = vsub.s32 %v2524_v9, %v2526_v10  ;;  %v4818_v9 = vld [vmem:[%s6709_s10 + $0x2] ss:$0 sm:$0xff] }
 0x247   : > { %v1732_v19 = vadd.f32 %v4805_v12, %v1731_v16  ;;  %v5171_v20 = vpop.f32.mrf.mxu0 }
 0x248   : > { %v5226_v21 = vpop.f32.mrf.mxu1  ;;  %5338 = vmatpush3.xpose.msk.msra.mxu0 %vm2551_vm2, %v1382_v15  ;;  %v2529_v12 = vsub.s32 0, %v2527_v11 }
 0x249   : > { %5363 = vmatpush3.xpose.msk.msra.mxu1 %vm2551_vm2, %v1732_v19  ;;  %5342 = vmatprep.subr.mxu0 %v5645_v7 }
 0x24a   : > { %5372 = vmatprep.subr.mxu1 %v5645_v7  ;;  %v4832_v13 = vmin.u32 %v2529_v12, %v2527_v11 }
 0x24b   : > { %5340 = vmatmul.mubr.msk.f32.vlgmr.msra.gmra.mxu0 %vm2551_vm2, %v734_v22 }
 0x24c   : > { %5365 = vmatmul.mubr.msk.f32.vlgmr.msra.gmra.mxu1 %vm2551_vm2, %v1084_v25  ;;  %5343 = vmatpush3.xpose.msk.msra.mxu0 %vm2551_vm2, %v1452_v26  ;;  %v2532_v15 = vand.u32 1, %v4832_v13  ;;  %vm2531_vm3 = vcmp.le.s32.totalorder %v4832_v13, 1  ;;  %v2536_v17 = vand.u32 3, %v4832_v13  ;;  %v2544_v18 = vand.u32 15, %v4832_v13 }
 0x24d   : > { %5344 = vmatprep.mubr.msk.f32.mxu0 %vm5646_vm1, %v5645_v7  ;;  %5347 = vmatprep.subr.mxu0 %v5645_v7  ;;  %vm2535_vm6 = vcmp.le.s32.totalorder %v4832_v13, 2  ;;  %vm2543_vm8 = vcmp.le.s32.totalorder %v4832_v13, 8  ;;  %v2548_v20 = vand.u32 31, %v4832_v13  ;;  %v2540_v23 = vand.u32 7, %v4832_v13 }
 0x24e   : > { %5374 = vmatprep.mubr.msk.f32.mxu1 %vm5646_vm1, %v5645_v7  ;;  %vm2533_vm4 = vcmp.eq.s32.totalorder %v2532_v15, 0  ;;  %vm2537_vm7 = vcmp.eq.s32.totalorder %v2536_v17, 0  ;;  %vm2545_vm9 = vcmp.eq.s32.totalorder %v2544_v18, 0  ;;  %vm2547_vm13 = vcmp.le.s32.totalorder %v4832_v13, 16  ;;  %v4819_v15 = vld [vmem:[%s6709_s10 + $0x3] ss:$0 sm:$0xff] }
 0x24f   : > { %v1521_v30 = vpop.f32.mrf.mxu0  ;;  %5345 = vmatmul.mubr.msk.f32.vlgmr.msra.gmra.mxu0 %vm2551_vm2, %v804_v27  ;;  %vm2534_vm5 = vmor %vm2531_vm3, %vm2533_vm4  ;;  %vm2549_vm14 = vcmp.eq.s32.totalorder %v2548_v20, 0  ;;  %vm2539_vm15 = vcmp.le.s32.totalorder %v4832_v13, 4  ;;  %vm2541_vm3 = vcmp.eq.s32.totalorder %v2540_v23, 0 }
 0x250   : > { %v1522_v32 = vadd.f32 %v4802_v28, %v1521_v30  ;;  %v1871_v33 = vpop.f32.mrf.mxu1  ;;  %5349 = vmatprep.mubr.msk.f32.mxu0 %vm5646_vm1, %v5645_v7  ;;  %vm2538_vm11 = vmor %vm2535_vm6, %vm2537_vm7  ;;  %vm3860_vm6 = vcmask 1043456  }
 0x251   : > { %v1872_v35 = vadd.f32 %v4807_v29, %v1871_v33  ;;  %v5193_v36 = vpop.f32.mrf.mxu0  ;;  %vm2546_vm12 = vmor %vm2543_vm8, %vm2545_vm9 }
 0x252   : > { %v5248_v37 = vpop.f32.mrf.mxu1  ;;  %5348 = vmatpush3.xpose.msk.msra.mxu0 %vm2551_vm2, %v1522_v32  ;;  %vm6406_vm4 = vmor %vm2547_vm13, %vm2549_vm14 }
 0x253   : > { %5373 = vmatpush3.xpose.msk.msra.mxu1 %vm2551_vm2, %v1872_v35  ;;  %5357 = vmatprep.subr.mxu0 %v5645_v7 }
 0x254   : > { %5382 = vmatprep.subr.mxu1 %v5645_v7 }
 0x255   : > { %5350 = vmatmul.mubr.msk.f32.vlgmr.msra.gmra.mxu0 %vm2551_vm2, %v874_v38 }
 0x256   : > { %5375 = vmatmul.mubr.msk.f32.vlgmr.msra.gmra.mxu1 %vm2551_vm2, %v1224_v39  ;;  %5359 = vmatprep.mubr.msk.f32.mxu0 %vm5646_vm1, %v5645_v7 }
 0x257   : > { %5384 = vmatprep.mubr.msk.f32.mxu1 %vm5646_vm1, %v5645_v7 }
 0x259   : > { %v1661_v42 = vpop.f32.mrf.mxu0 }
 0x25a   : > { %v1662_v44 = vadd.f32 %v4804_v40, %v1661_v42  ;;  %v2099_v45 = vpop.f32.mrf.mxu1 }
 0x25b   : > { %v2100_v46 = vadd.f32 %v4817_v41, %v2099_v45  ;;  %v5215_v47 = vpop.f32.mrf.mxu0 }
 0x25c   : > { %v5270_v48 = vpop.f32.mrf.mxu1  ;;  %5358 = vmatpush3.xpose.msk.msra.mxu0 %vm2551_vm2, %v1662_v44 }
 0x25d   : > { %5383 = vmatpush3.msra.mxu1 %v2100_v46  ;;  %5367 = vmatprep.subr.mxu0 %v5645_v7 }
 0x25e   : > { %5392 = vmatprep.subr.mxu1 %v5645_v7 }
 0x25f   : > { %5360 = vmatmul.mubr.msk.f32.vlgmr.msra.gmra.mxu0 %vm2551_vm2, %v1014_v49 }
 0x260   : > { %5369 = vmatprep.mubr.msk.f32.mxu0 %vm5646_vm1, %v5645_v7 }
 0x263   : > { %v1801_v51 = vpop.f32.mrf.mxu0 }
 0x264   : > { %v1802_v53 = vadd.f32 %v4806_v50, %v1801_v51  ;;  %v6382_v54 = vpop.f32.mrf.mxu1 }
 0x265   : > { %v5237_v55 = vpop.f32.mrf.mxu0  ;;  %v2240_v20 = vadd.f32 %v4819_v15, %v6382_v54 }
 0x266   : > { %v5292_v56 = vpop.f32.mrf.mxu1  ;;  %5368 = vmatpush3.xpose.msk.msra.mxu0 %vm2551_vm2, %v1802_v53 }
 0x267   : > { %5377 = vmatprep.subr.mxu0 %v5645_v7 }
 0x269   : > { %5370 = vmatmul.mubr.msk.f32.vlgmr.msra.gmra.mxu0 %vm2551_vm2, %v1154_v57 }
 0x26a   : > { %5379 = vmatprep.mubr.msk.f32.mxu0 %vm5646_vm1, %v5645_v7 }
 0x26d   : > { %v2029_v59 = vpop.f32.mrf.mxu0 }
 0x26e   : > { %v2030_v60 = vadd.f32 %v4816_v58, %v2029_v59  ;;  %v6393_v61 = vpop.f32.mrf.mxu1 }
 0x26f   : > { %v5259_v62 = vpop.f32.mrf.mxu0 }
 0x270   : > { %v5314_v63 = vpop.f32.mrf.mxu1  ;;  %5378 = vmatpush3.msra.mxu0 %v2030_v60 }
 0x271   : > { %5387 = vmatprep.subr.mxu0 %v5645_v7 }
 0x277   : > { %v6396_v24 = vpop.f32.mrf.mxu0 }
 0x278   : > { %v6398_v0 = vpop.f32.mrf.mxu1 }
 0x279   : > { %v5281_v1 = vpop.f32.mrf.mxu0 }
 0x27a   : > { %v5336_v2 = vpop.f32.mrf.mxu1 }
 0x27f   : > { %v6400_v3 = vpop.f32.mrf.mxu0 }
 0x281   : > { %v5303_v4 = vpop.f32.mrf.mxu0 }
 0x287   : > { %v6402_v5 = vpop.f32.mrf.mxu0 }
 0x289   : > { %v5325_v6 = vpop.f32.mrf.mxu0 }
 0x302   : > { %v2852_v14 = vpop.f32.mrf.mxu1 }
 0x303   : > { %v3163_v32 = vsel %vm2546_vm12, %v2852_v14, -inf  ;;  %v2170_v14 = vadd.f32 %v4818_v9, %v6396_v24 }
 0x304   : > { %v5356_v16 = vpop.f32.mrf.mxu1  ;;  %v3178_v35 = vsel %vm3168_vm10, %v3163_v32, -inf }
 0x30b   : > { %v2624_v19 = vpop.f32.mrf.mxu0 }
 0x30c   : > { %v3160_v21 = vsel %vm2534_vm5, %v2624_v19, -inf  ;;  %v3004_v22 = vpop.f32.mrf.mxu1  ;;  %vm2542_vm5 = vmor %vm2539_vm15, %vm2541_vm3 }
 0x30d   : > { %v5341_v25 = vpop.f32.mrf.mxu0  ;;  %v3169_v26 = vsel %vm3168_vm10, %v3160_v21, -inf  ;;  %v3165_v36 = vsel %vm6406_vm4, %v3004_v22, -inf }
 0x30e   : > { %v5366_v27 = vpop.f32.mrf.mxu1  ;;  %3170 = vmax.xlane.f32.xlu1 %v3169_v26  ;;  %v3184_v42 = vsel %vm3168_vm10, %v3165_v36, -inf  ;;  %v4820_v25 = vld [vmem:[%s6709_s10 + $0x4] ss:$0 sm:$0xff] }
 0x30f   : > { %v2700_v28 = vpop.f32.mrf.mxu0  ;;  %v4823_v27 = vld [vmem:[%s6709_s10 + $0x7] ss:$0 sm:$0xff] }
 0x310   : > { %v3161_v29 = vsel %vm2538_vm11, %v2700_v28, -inf }
 0x311   : > { %v5346_v30 = vpop.f32.mrf.mxu0  ;;  %v3172_v31 = vsel %vm3168_vm10, %v3161_v29, -inf }
 0x312   : > { %3173 = vmax.xlane.f32.xlu1 %v3172_v31  ;;  %v2310_v30 = vadd.f32 %v4820_v25, %v6400_v3 }
 0x315   : > { %v2776_v34 = vpop.f32.mrf.mxu0 }
 0x316   : > { %v3162_v37 = vsel %vm2542_vm5, %v2776_v34, -inf  ;;  %v3156_v38 = vpop.f32.mrf.mxu1  ;;  %3179 = vmax.xlane.f32.xlu1 %v3178_v35 }
 0x317   : > { %v5351_v39 = vpop.f32.mrf.mxu0  ;;  %v3175_v40 = vsel %vm3168_vm10, %v3162_v37, -inf  ;;  %v3167_v43 = vsel %vm6406_vm4, %v3156_v38, -inf }
 0x318   : > { %v5376_v41 = vpop.f32.mrf.mxu1  ;;  %3176 = vmax.xlane.f32.xlu0 %v3175_v40  ;;  %v3190_v44 = vsel %vm3168_vm10, %v3167_v43, -inf }
 0x31a   : > { %3185 = vmax.xlane.f32.xlu1 %v3184_v42 }
 0x31e   : > { %3191 = vmax.xlane.f32.xlu1 %v3190_v44 }
 0x31f   : > { %v2928_v45 = vpop.f32.mrf.mxu0 }
 0x320   : > { %v3164_v46 = vsel %vm6406_vm4, %v2928_v45, -inf }
 0x321   : > { %v5361_v47 = vpop.f32.mrf.mxu0  ;;  %v3181_v48 = vsel %vm3168_vm10, %v3164_v46, -inf }
 0x322   : > { %3182 = vmax.xlane.f32.xlu0 %v3181_v48 }
 0x329   : > { %v3080_v49 = vpop.f32.mrf.mxu0 }
 0x32a   : > { %v6423_v50 = vsel %vm6406_vm4, %v3080_v49, -inf }
 0x32b   : > { %v5371_v51 = vpop.f32.mrf.mxu0  ;;  %v3187_v52 = vsel %vm3168_vm10, %v6423_v50, -inf }
 0x32c   : > { %3188 = vmax.xlane.f32.xlu0 %v3187_v52 }
 0x397   : > { %v3171_v53 = vpop.xlane.xlu1 %3170 }
 0x398   : > { %v3193_v55 = vsub.f32 %v3160_v21, %v3171_v53  ;;  %v4821_v21 = vld [vmem:[%s6709_s10 + $0x5] ss:$0 sm:$0xff]  ;;  %v3851_v53 = vld [vmem:[%s6710_s11 + $0x8] sm:$0xf] }
 0x399   : > { %v2380_v26 = vadd.f32 %v4821_v21, %v6393_v61 }
 0x39a   : > { %v3201_v56 = vmul.f32 1.442695, %v3193_v55 }
 0x39b   : > { %v3174_v57 = vpop.xlane.xlu1 %3173 }
 0x39c   : > { %5546 = vpow2.f32 %v3201_v56  ;;  %v3194_v58 = vsub.f32 %v3161_v29, %v3174_v57 }
 0x39e   : > { %v3203_v59 = vmul.f32 1.442695, %v3194_v58 }
 0x39f   : > { %v3180_v60 = vpop.xlane.xlu1 %3179 }
 0x3a0   : > { %5548 = vpow2.f32 %v3203_v59  ;;  %v3196_v62 = vsub.f32 %v3163_v32, %v3180_v60  ;;  %v2520_v32 = vadd.f32 %v4823_v27, %v6398_v0  ;;  %v3852_v60 = vld [vmem:[%s6710_s11 + $0xc] sm:$0xf] }
 0x3a1   : > { %v3177_v63 = vpop.xlane.xlu0 %3176 }
 0x3a2   : > { %v3207_v1 = vmul.f32 1.442695, %v3196_v62  ;;  %v3195_v2 = vsub.f32 %v3162_v37, %v3177_v63 }
 0x3a3   : > { %v3186_v4 = vpop.xlane.xlu1 %3185 }
 0x3a4   : > { %5550 = vpow2.f32 %v3207_v1  ;;  %v3205_v6 = vmul.f32 1.442695, %v3195_v2  ;;  %v3198_v8 = vsub.f32 %v3165_v36, %v3186_v4  ;;  %v4822_v36 = vld [vmem:[%s6709_s10 + $0x6] ss:$0 sm:$0xff]  ;;  %v3854_v4 = vld [vmem:[%s6710_s11 + $0x14] sm:$0xf] }
 0x3a5   : > { %v2450_v39 = vadd.f32 %v4822_v36, %v6402_v5  ;;  %v3849_v5 = vld [vmem:[%s6710_s11] sm:$0xf] }
 0x3a6   : > { %5552 = vpow2.f32 %v3205_v6  ;;  %v3211_v10 = vmul.f32 1.442695, %v3198_v8 }
 0x3a7   : > { %v3192_v11 = vpop.xlane.xlu1 %3191 }
 0x3a8   : > { %5554 = vpow2.f32 %v3211_v10  ;;  %v3200_v12 = vsub.f32 %v3167_v43, %v3192_v11  ;;  %v3850_v43 = vld [vmem:[%s6710_s11 + $0x4] sm:$0xf]  ;;  %v3853_v11 = vld [vmem:[%s6710_s11 + $0x10] sm:$0xf] }
 0x3a9   : > { %v5547_v13 = vpop.eup %5546 }
 0x3aa   : > { %v3215_v16 = vmul.f32 1.442695, %v3200_v12  ;;  %5380 = vmatmul.mubr.msk.f32.vlgmr.msra.gmra.mxu0 %vm3168_vm10, %v5547_v13  ;;  %v3217_v17 = vsel %vm3168_vm10, %v5547_v13, 0.0 }
 0x3ab   : > { %v3183_v18 = vpop.xlane.xlu0 %3182  ;;  %5388 = vmatpush3.msra.mxu0 %v2170_v14  ;;  %3218 = vadd.xlane.f32.xlu0 %v3217_v17 }
 0x3ac   : > { %5556 = vpow2.f32 %v3215_v16  ;;  %v3197_v19 = vsub.f32 %v3164_v46, %v3183_v18  ;;  %5389 = vmatprep.mubr.msk.f32.mxu0 %vm5646_vm1, %v5645_v7  ;;  %5397 = vmatprep.subr.mxu0 %v5645_v7  ;;  %v3856_v16 = vld [vmem:[%s6710_s11 + $0x1c] sm:$0xf] }
 0x3ad   : > { %v5549_v24 = vpop.eup %5548 }
 0x3ae   : > { %v3209_v22 = vmul.f32 1.442695, %v3197_v19  ;;  %5385 = vmatmul.mubr.msk.f32.vlgmr.msra.gmra.mxu1 %vm3168_vm10, %v5549_v24  ;;  %v3220_v23 = vsel %vm3168_vm10, %v5549_v24, 0.0 }
 0x3af   : > { %5393 = vmatpush3.msra.mxu1 %v2240_v20  ;;  %3221 = vadd.xlane.f32.xlu1 %v3220_v23 }
 0x3b0   : > { %5558 = vpow2.f32 %v3209_v22  ;;  %5394 = vmatprep.mubr.msk.f32.mxu1 %vm5646_vm1, %v5645_v7  ;;  %5402 = vmatprep.subr.mxu1 %v5645_v7 }
 0x3b1   : > { %v5551_v54 = vpop.eup %5550 }
 0x3b2   : > { %5395 = vmatmul.mubr.msk.f32.vlgmr.msra.gmra.mxu1 %vm3168_vm10, %v5551_v54  ;;  %v3226_v28 = vsel %vm3168_vm10, %v5551_v54, 0.0  ;;  %v3855_v54 = vld [vmem:[%s6710_s11 + $0x18] sm:$0xf] }
 0x3b3   : > { %v5553_v29 = vpop.eup %5552  ;;  %5403 = vmatpush3.msra.mxu1 %v2380_v26  ;;  %3227 = vadd.xlane.f32.xlu1 %v3226_v28 }
 0x3b4   : > { %5390 = vmatmul.mubr.msk.f32.vlgmr.msra.gmra.mxu0 %vm3168_vm10, %v5553_v29  ;;  %v3223_v31 = vsel %vm3168_vm10, %v5553_v29, 0.0  ;;  %5404 = vmatprep.mubr.msk.f32.mxu1 %vm5646_vm1, %v5645_v7 }
 0x3b5   : > { %v5555_v61 = vpop.eup %5554  ;;  %v3189_v33 = vpop.xlane.xlu0 %3188  ;;  %5398 = vmatpush3.msra.mxu0 %v2310_v30  ;;  %3224 = vadd.xlane.f32.xlu0 %v3223_v31 }
 0x3b6   : > { %v3199_v34 = vsub.f32 %v6423_v50, %v3189_v33  ;;  %5412 = vmatprep.subr.mxu1 %v5645_v7  ;;  %5405 = vmatmul.mubr.msk.f32.vlgmr.msra.gmra.mxu1 %vm3168_vm10, %v5555_v61  ;;  %v3232_v3 = vsel %vm3168_vm10, %v5555_v61, 0.0 }
 0x3b7   : > { %5413 = vmatpush3.msra.mxu1 %v2520_v32  ;;  %3233 = vadd.xlane.f32.xlu1 %v3232_v3 }
 0x3b8   : > { %v3213_v35 = vmul.f32 1.442695, %v3199_v34  ;;  %5399 = vmatprep.mubr.msk.f32.mxu0 %vm5646_vm1, %v5645_v7  ;;  %5407 = vmatprep.subr.mxu0 %v5645_v7 }
 0x3b9   : > { %v5557_v0 = vpop.eup %5556  ;;  %5414 = vmatprep.mubr.msk.f32.mxu1 %vm5646_vm1, %v5645_v7  ;;  %5422 = vmatprep.subr.mxu1 %v5645_v7 }
 0x3ba   : > { %5560 = vpow2.f32 %v3213_v35  ;;  %5415 = vmatmul.mubr.msk.f32.vlgmr.msra.gmra.mxu1 %vm3168_vm10, %v5557_v0  ;;  %v3238_v37 = vsel %vm3168_vm10, %v5557_v0, 0.0 }
 0x3bb   : > { %3239 = vadd.xlane.f32.xlu1 %v3238_v37  ;;  %5424 = vmatprep.mubr.msk.f32.mxu1 %vm5646_vm1, %v5645_v7 }
 0x3bc   : > { %5423 = vmatpush3.msk.msra.mxu1 %vm3860_vm6, %v3850_v43 }
 0x3bd   : > { %v5559_v38 = vpop.eup %5558  ;;  %5432 = vmatprep.subr.mxu1 %v5645_v7 }
 0x3be   : > { %5400 = vmatmul.mubr.msk.f32.vlgmr.msra.gmra.mxu0 %vm3168_vm10, %v5559_v38  ;;  %v3229_v40 = vsel %vm3168_vm10, %v5559_v38, 0.0 }
 0x3bf   : > { %5408 = vmatpush3.msra.mxu0 %v2450_v39  ;;  %3230 = vadd.xlane.f32.xlu0 %v3229_v40 }
 0x3c0   : > { %5409 = vmatprep.mubr.msk.f32.mxu0 %vm5646_vm1, %v5645_v7  ;;  %5417 = vmatprep.subr.mxu0 %v5645_v7 }
 0x3c7   : > { %v5561_v41 = vpop.eup %5560 }
 0x3c8   : > { %5410 = vmatmul.mubr.msk.f32.vlgmr.msra.gmra.mxu0 %vm3168_vm10, %v5561_v41  ;;  %v3235_v42 = vsel %vm3168_vm10, %v5561_v41, 0.0 }
 0x3c9   : > { %3236 = vadd.xlane.f32.xlu0 %v3235_v42  ;;  %5419 = vmatprep.mubr.msk.f32.mxu0 %vm5646_vm1, %v5645_v7 }
 0x3ca   : > { %5418 = vmatpush3.msk.msra.mxu0 %vm3860_vm6, %v3849_v5 }
 0x3cb   : > { %5427 = vmatprep.subr.mxu0 %v5645_v7 }
 0x434   : > { %v3219_v45 = vpop.xlane.xlu0 %3218 }
 0x435   : > { %5562 = vrcp.f32 %v3219_v45 }
 0x438   : > { %v3222_v44 = vpop.xlane.xlu1 %3221 }
 0x439   : > { %5564 = vrcp.f32 %v3222_v44 }
 0x43c   : > { %v3228_v46 = vpop.xlane.xlu1 %3227 }
 0x43d   : > { %5566 = vrcp.f32 %v3228_v46 }
 0x43e   : > { %v3225_v47 = vpop.xlane.xlu0 %3224 }
 0x43f   : > { %5568 = vrcp.f32 %v3225_v47 }
 0x440   : > { %v3234_v48 = vpop.xlane.xlu1 %3233 }
 0x441   : > { %5570 = vrcp.f32 %v3234_v48 }
 0x442   : > { %v5563_v49 = vpop.eup %5562 }
 0x444   : > { %v3240_v50 = vpop.xlane.xlu1 %3239 }
 0x445   : > { %5572 = vrcp.f32 %v3240_v50 }
 0x446   : > { %v5565_v56 = vpop.eup %5564 }
 0x448   : > { %v3231_v57 = vpop.xlane.xlu0 %3230 }
 0x449   : > { %5574 = vrcp.f32 %v3231_v57 }
 0x44a   : > { %v5567_v63 = vpop.eup %5566 }
 0x44c   : > { %v5569_v6 = vpop.eup %5568 }
 0x44e   : > { %v5571_v12 = vpop.eup %5570 }
 0x452   : > { %v3237_v17 = vpop.xlane.xlu0 %3236  ;;  %v5573_v19 = vpop.eup %5572 }
 0x453   : > { %5576 = vrcp.f32 %v3237_v17  ;;  %v4620_v17 = vld [vmem:[%s6714_s15 + $0x60] sm:$0xff] }
 0x456   : > { %v5575_v22 = vpop.eup %5574 }
 0x460   : > { %v5577_v27 = vpop.eup %5576 }
 0x46a   : > { %v3310_v51 = vpop.f32.mrf.mxu0 }
 0x46b   : > { %v3841_v52 = vmul.f32 %v5563_v49, %v3310_v51 }
 0x46c   : > { %v5381_v55 = vpop.f32.mrf.mxu0 }
 0x46d   : > { %5420 = vmatmul.mubr.msk.f32.vlgmr.msra.gmra.mxu0 %vm2551_vm2, %v3841_v52 }
 0x46e   : > { %v3383_v58 = vpop.f32.mrf.mxu1  ;;  %5428 = vmatpush3.msk.msra.mxu0 %vm3860_vm6, %v3851_v53  ;;  %5429 = vmatprep.mubr.msk.f32.mxu0 %vm5646_vm1, %v5645_v7 }
 0x46f   : > { %v3842_v59 = vmul.f32 %v5565_v56, %v3383_v58  ;;  %5437 = vmatprep.subr.mxu0 %v5645_v7  ;;  %v4873_v58 = vld [vmem:[%s6711_s12] ss:$0 sm:$0xff] }
 0x470   : > { %v5386_v62 = vpop.f32.mrf.mxu1 }
 0x471   : > { %5425 = vmatmul.mubr.msk.f32.vlgmr.msra.gmra.mxu1 %vm2551_vm2, %v3842_v59  ;;  %v5582_v62 = vld [vmem:[%s5791_s18] sm:$0xff] }
 0x472   : > { %v3529_v1 = vpop.f32.mrf.mxu1  ;;  %5433 = vmatpush3.msk.msra.mxu1 %vm3860_vm6, %v3852_v60  ;;  %5434 = vmatprep.mubr.msk.f32.mxu1 %vm5646_vm1, %v5645_v7 }
 0x473   : > { %v3844_v2 = vmul.f32 %v5567_v63, %v3529_v1  ;;  %5442 = vmatprep.subr.mxu1 %v5645_v7 }
 0x474   : > { %v3456_v8 = vpop.f32.mrf.mxu0  ;;  %v5396_v9 = vpop.f32.mrf.mxu1 }
 0x475   : > { %v3843_v10 = vmul.f32 %v5569_v6, %v3456_v8  ;;  %5435 = vmatmul.mubr.msk.f32.vlgmr.msra.gmra.mxu1 %vm2551_vm2, %v3844_v2 }
 0x476   : > { %v5391_v13 = vpop.f32.mrf.mxu0  ;;  %v3675_v14 = vpop.f32.mrf.mxu1  ;;  %5443 = vmatpush3.msk.msra.mxu1 %vm3860_vm6, %v3854_v4  ;;  %5444 = vmatprep.mubr.msk.f32.mxu1 %vm5646_vm1, %v5645_v7 }
 0x477   : > { %5430 = vmatmul.mubr.msk.f32.vlgmr.msra.gmra.mxu0 %vm2551_vm2, %v3843_v10  ;;  %v3846_v15 = vmul.f32 %v5571_v12, %v3675_v14  ;;  %5452 = vmatprep.subr.mxu1 %v5645_v7  ;;  %v4522_v10 = vld [vmem:[%s6712_s13 + $0x18] sm:$0xff]  ;;  %v4520_v12 = vld [vmem:[%s6712_s13 + $0x8] sm:$0xff]  ;;  %v4519_v13 = vld [vmem:[%s6712_s13] sm:$0xff] }
 0x478   : > { %v5406_v18 = vpop.f32.mrf.mxu1  ;;  %5438 = vmatpush3.msk.msra.mxu0 %vm3860_vm6, %v3853_v11  ;;  %5439 = vmatprep.mubr.msk.f32.mxu0 %vm5646_vm1, %v5645_v7  ;;  %v4521_v11 = vld [vmem:[%s6712_s13 + $0x10] sm:$0xff]  ;;  %v4623_v14 = vld [vmem:[%s6714_s15 + $0x78] sm:$0xff] }
 0x479   : > { %5445 = vmatmul.mubr.msk.f32.vlgmr.msra.gmra.mxu1 %vm2551_vm2, %v3846_v15  ;;  %5447 = vmatprep.subr.mxu0 %v5645_v7  ;;  %v4622_v15 = vld [vmem:[%s6714_s15 + $0x70] sm:$0xff] }
 0x47a   : > { %v3821_v24 = vpop.f32.mrf.mxu1  ;;  %5453 = vmatpush3.msk.msra.mxu1 %vm3860_vm6, %v3856_v16  ;;  %5454 = vmatprep.mubr.msk.f32.mxu1 %vm5646_vm1, %v5645_v7  ;;  %v4621_v16 = vld [vmem:[%s6714_s15 + $0x68] sm:$0xff] }
 0x47b   : > { %v3848_v20 = vmul.f32 %v5573_v19, %v3821_v24  ;;  %5468 = vmatprep.subr.mxu1 %v5645_v7 }
 0x47c   : > { %v5416_v21 = vpop.f32.mrf.mxu1 }
 0x47d   : > { %5455 = vmatmul.mubr.msk.f32.vlgmr.msra.gmra.mxu1 %vm2551_vm2, %v3848_v20  ;;  %v4874_v21 = vld [vmem:[%s6736_s3] ss:$0 sm:$0xff]  ;;  %s5583_s3 = scalar_lea.vmem %s4718_s0, 128 }
 0x47e   : > { %v3602_v23 = vpop.f32.mrf.mxu0  ;;  %5500 = vmatprep.mubr.msk.f32.mxu1 %vm5646_vm1, %v5645_v7  ;;  %5469 = vmatpush3.msra.mxu1 %v4623_v14  ;;  %p5584_p11 = scmp.ne.s32.totalorder %s4718_s0, %s5583_s3  ;;  %p5591_p1 = scmp.lt.s32.totalorder %s5589_s23, %s5583_s3 }
 0x47f   : > { %v3845_v25 = vmul.f32 %v5575_v22, %v3602_v23  ;;  %5470 = vmatprep.subr.mxu1 %v5645_v7  ;;  %v4875_v23 = vld [vmem:[%s6703_s4] ss:$0 sm:$0xff] }
 0x480   : > { %v5401_v26 = vpop.f32.mrf.mxu0  ;;  %5471 = vmatpush3.msra.mxu1 %v4622_v15  ;;  %p5585_p12 = pnand %p5584_p11, %p5776_p5  ;;  %p5592_p2 = por %p5591_p1, %p5590_p0 }
 0x481   : > { %5440 = vmatmul.mubr.msk.f32.vlgmr.msra.gmra.mxu0 %vm2551_vm2, %v3845_v25  ;;  %5472 = vmatprep.subr.mxu1 %v5645_v7  ;;  %v4619_v26 = vld [vmem:[%s6714_s15 + $0x58] sm:$0xff] }
 0x482   : > { %5448 = vmatpush3.msk.msra.mxu0 %vm3860_vm6, %v3855_v54  ;;  %5449 = vmatprep.mubr.msk.f32.mxu0 %vm5646_vm1, %v5645_v7  ;;  %p5586_p13 = pneg %p5585_p12 }
 0x483   : > { %5457 = vmatprep.subr.mxu0 %v5645_v7  ;;  %5473 = vmatpush3.msra.mxu1 %v4621_v16 }
 0x484   : > { %5474 = vmatprep.subr.mxu1 %v5645_v7  ;;  %p5593_p3 = pnand %p5592_p2, %p5586_p13 }
 0x485   : > { %5475 = vmatpush3.msra.mxu1 %v4620_v17 }
 0x486   : > { %5476 = vmatprep.subr.mxu1 %v5645_v7 }
 0x487   : > { %5477 = vmatpush3.msra.mxu1 %v4619_v26 }
 0x488   : > { %v3748_v28 = vpop.f32.mrf.mxu0  ;;  %5478 = vmatprep.subr.mxu1 %v5645_v7 }
 0x489   : > { %v3847_v29 = vmul.f32 %v5577_v27, %v3748_v28  ;;  %v4618_v27 = vld [vmem:[%s6714_s15 + $0x50] sm:$0xff]  ;;  %v4617_v28 = vld [vmem:[%s6714_s15 + $0x48] sm:$0xff] }
 0x48a   : > { %v5411_v30 = vpop.f32.mrf.mxu0  ;;  %5479 = vmatpush3.msra.mxu1 %v4618_v27 }
 0x48b   : > { %5450 = vmatmul.mubr.msk.f32.vlgmr.msra.gmra.mxu0 %vm2551_vm2, %v3847_v29  ;;  %5480 = vmatprep.subr.mxu1 %v5645_v7  ;;  %v4616_v29 = vld [vmem:[%s6714_s15 + $0x40] sm:$0xff]  ;;  %v4615_v30 = vld [vmem:[%s6714_s15 + $0x38] sm:$0xff] }
 0x48c   : > { %5465 = vmatprep.mubr.msk.f32.mxu0 %vm5646_vm1, %v5645_v7  ;;  %5458 = vmatpush3.msra.mxu0 %v4522_v10 }
 0x48d   : > { %5459 = vmatprep.subr.mxu0 %v5645_v7  ;;  %5481 = vmatpush3.msra.mxu1 %v4617_v28 }
 0x48e   : > { %5460 = vmatpush3.msra.mxu0 %v4521_v11  ;;  %5482 = vmatprep.subr.mxu1 %v5645_v7 }
 0x48f   : > { %5461 = vmatprep.subr.mxu0 %v5645_v7  ;;  %5483 = vmatpush3.msra.mxu1 %v4616_v29 }
 0x490   : > { %5462 = vmatpush3.msra.mxu0 %v4520_v12  ;;  %5484 = vmatprep.subr.mxu1 %v5645_v7 }
 0x491   : > { %5463 = vmatprep.subr.mxu0 %v5645_v7  ;;  %5485 = vmatpush3.msra.mxu1 %v4615_v30 }
 0x492   : > { %5464 = vmatpush3.msra.mxu0 %v4519_v13  ;;  %5486 = vmatprep.subr.mxu1 %v5645_v7 }
 0x52d   : > { %v3930_v31 = vpop.f32.mrf.mxu0 }
 0x52e   : > { %v4466_v40 = vsel %vm547_vm0, %v3930_v31, 0.0  ;;  %v4614_v31 = vld [vmem:[%s6714_s15 + $0x30] sm:$0xff] }
 0x52f   : > { %v5421_v61 = vpop.f32.mrf.mxu0  ;;  %5487 = vmatpush3.msra.mxu1 %v4614_v31 }
 0x530   : > { %5488 = vmatprep.subr.mxu1 %v5645_v7  ;;  %v4613_v61 = vld [vmem:[%s6714_s15 + $0x28] sm:$0xff] }
 0x531   : > { %v4006_v32 = vpop.f32.mrf.mxu1  ;;  %5489 = vmatpush3.msra.mxu1 %v4613_v61 }
 0x532   : > { %v4467_v38 = vsel %vm547_vm0, %v4006_v32, 0.0  ;;  %5490 = vmatprep.subr.mxu1 %v5645_v7  ;;  %v4612_v32 = vld [vmem:[%s6714_s15 + $0x20] sm:$0xff] }
 0x533   : > { %v5426_v33 = vpop.f32.mrf.mxu1  ;;  %v4468_v42 = vadd.f32 %v4467_v38, %v4466_v40  ;;  %5491 = vmatpush3.msra.mxu1 %v4612_v32 }
 0x534   : > { %5492 = vmatprep.subr.mxu1 %v5645_v7  ;;  %v4611_v33 = vld [vmem:[%s6714_s15 + $0x18] sm:$0xff] }
 0x535   : > { %v4158_v34 = vpop.f32.mrf.mxu1  ;;  %5493 = vmatpush3.msra.mxu1 %v4611_v33 }
 0x536   : > { %v4471_v46 = vsel %vm547_vm0, %v4158_v34, 0.0  ;;  %v4610_v34 = vld [vmem:[%s6714_s15 + $0x10] sm:$0xff]  ;;  %5494 = vmatprep.subr.mxu1 %v5645_v7 }
 0x537   : > { %v4082_v3 = vpop.f32.mrf.mxu0  ;;  %v5436_v35 = vpop.f32.mrf.mxu1  ;;  %5495 = vmatpush3.msra.mxu1 %v4610_v34 }
 0x538   : > { %v4469_v41 = vsel %vm547_vm0, %v4082_v3, 0.0  ;;  %v4609_v3 = vld [vmem:[%s6714_s15 + $0x8] sm:$0xff]  ;;  %5496 = vmatprep.subr.mxu1 %v5645_v7  ;;  %v4608_v35 = vld [vmem:[%s6714_s15] sm:$0xff] }
 0x539   : > { %v5431_v0 = vpop.f32.mrf.mxu0  ;;  %v4310_v36 = vpop.f32.mrf.mxu1  ;;  %v4470_v43 = vadd.f32 %v4469_v41, %v4468_v42  ;;  %5497 = vmatpush3.msra.mxu1 %v4609_v3 }
 0x53a   : > { %v4475_v50 = vsel %vm547_vm0, %v4310_v36, 0.0  ;;  %5498 = vmatprep.subr.mxu1 %v5645_v7  ;;  %v4876_v0 = vld [vmem:[%s6713_s14] ss:$0 sm:$0xff] }
 0x53b   : > { %v5446_v37 = vpop.f32.mrf.mxu1  ;;  %v4472_v48 = vadd.f32 %v4471_v46, %v4470_v43  ;;  %5499 = vmatpush3.msra.mxu1 %v4608_v35  ;;  %v4878_v7 = vld [vmem:[%s6715_s16] ss:$0 sm:$0xff] }
 0x53d   : > { %v4462_v39 = vpop.f32.mrf.mxu1 }
 0x53e   : > { %v4479_v57 = vsel %vm547_vm0, %v4462_v39, 0.0 }
 0x53f   : > { %v5456_v5 = vpop.f32.mrf.mxu1 }
 0x541   : > { %v4234_v44 = vpop.f32.mrf.mxu0 }
 0x542   : > { %v4473_v47 = vsel %vm547_vm0, %v4234_v44, 0.0 }
 0x543   : > { %v5441_v45 = vpop.f32.mrf.mxu0  ;;  %v4474_v49 = vadd.f32 %v4473_v47, %v4472_v48 }
 0x545   : > { %v4476_v52 = vadd.f32 %v4475_v50, %v4474_v49 }
 0x54b   : > { %v4386_v51 = vpop.f32.mrf.mxu0 }
 0x54c   : > { %v4477_v53 = vsel %vm547_vm0, %v4386_v51, 0.0 }
 0x54d   : > { %v4478_v55 = vadd.f32 %v4477_v53, %v4476_v52  ;;  %v5451_v56 = vpop.f32.mrf.mxu0 }
 0x54f   : > { %v4480_v59 = vadd.f32 %v4479_v57, %v4478_v55 }
 0x551   : > { %v4488_v60 = vadd.f32 %v4873_v58, %v4480_v59 }
 0x553   : > { %v6566_v63 = vadd.f32 %v5582_v62, %v4488_v60 }
 0x555   : > { %v4492_v1 = vsel %vm547_vm0, %v6566_v63, 0.0 }
 0x556   : > { %4493 = vadd.xlane.f32.xlu0 %v4492_v1 }
 0x5df   : > { %v4494_v2 = vpop.xlane.xlu0 %4493 }
 0x5e0   : > { %v4495_v4 = vmul.f32 0.03125, %v4494_v2 }
 0x5e2   : > { %v4496_v6 = vsub.f32 %v6566_v63, %v4495_v4 }
 0x5e4   : > { %v4497_v8 = vmul.f32 %v4496_v6, %v4496_v6 }
 0x5e6   : > { %v4498_v9 = vsel %vm547_vm0, %v4497_v8, 0.0 }
 0x5e7   : > { %4499 = vadd.xlane.f32.xlu1 %v4498_v9 }
 0x670   : > { %v4500_v18 = vpop.xlane.xlu1 %4499 }
 0x671   : > { %v4501_v19 = vmul.f32 0.03125, %v4500_v18 }
 0x673   : > { %v4502_v24 = vadd.f32 1e-05, %v4501_v19 }
 0x675   : > { %5578 = vrsqrt.f32 %v4502_v24 }
 0x682   : > { %v5579_v20 = vpop.eup %5578 }
 0x683   : > { %v4504_v22 = vmul.f32 %v5579_v20, %v4496_v6 }
 0x685   : > { %v4511_v25 = vmul.f32 %v4874_v21, %v4504_v22 }
 0x687   : > { %v4518_v54 = vadd.f32 %v4875_v23, %v4511_v25 }
 0x689   : > { %5466 = vmatmul.mubr.msk.f32.vlgmr.msra.gmra.mxu0 %vm547_vm0, %v4518_v54 }
 0x749   : > { %v4599_v36 = vpop.f32.mrf.mxu0 }
 0x74a   : > { %v4600_v37 = vadd.f32 %v4876_v0, %v4599_v36 }
 0x74b   : > { %v5467_v38 = vpop.f32.mrf.mxu0 }
 0x74c   : > { %v4604_v39 = vmul.f32 0.70710677, %v4600_v37  ;;  %v4603_v41 = vmul.f32 0.5, %v4600_v37 }
 0x74e   : > { %5580 = verf.f32 %v4604_v39 }
 0x75b   : > { %v5581_v40 = vpop.eup %5580 }
 0x75c   : > { %v4606_v42 = vadd.f32 1.0, %v5581_v40 }
 0x75e   : > { %v4607_v5 = vmul.f32 %v4606_v42, %v4603_v41 }
 0x760   : > { %5501 = vmatmul.mubr.f32.vlgmr.msra.gmra.mxu1 %v4607_v5 }
 0x820   : > { %v4697_v43 = vpop.f32.mrf.mxu1 }
 0x821   : > { %v4698_v44 = vadd.f32 %v4878_v7, %v4697_v43 }
 0x822   : > { %v5502_v45 = vpop.f32.mrf.mxu1 }
 0x823   : > { %v4701_v46 = vadd.f32 %v4698_v44, %v6566_v63 }
 0x825   : > { %4702 = vst.msk [vmem:[%s539_s26] sm:$0xff] %vm547_vm0, %v4701_v46 }
 0x826   : > { %5596 = shalt.err (!%p5593_p3)
}
 0x827   : > { %s5597_s29 = scalar_lea.hbm %s4715_s30, 128  ;;  %s5601_s26 = scalar_lea.hbm %s6716_s17, 256 }
 0x828   : > { %p5598_p4 = scmp.ne.s32.totalorder %s4715_s30, %s5597_s29  ;;  %p5602_p9 = scmp.lt.s32.totalorder %s4715_s30, %s6716_s17 }
 0x829   : > { %p5603_p10 = scmp.lt.s32.totalorder %s5601_s26, %s5597_s29 }
 0x82a   : > { %p5599_p7 = pnand %p5598_p4, %p5776_p5 }
 0x82b   : > { %p5604_p11 = por %p5603_p10, %p5602_p9 }
 0x82c   : > { %p5600_p8 = pneg %p5599_p7 }
 0x82e   : > { %p5605_p12 = pnand %p5604_p11, %p5600_p8 }
 0x830   : > { %5608 = shalt.err (!%p5605_p12)
}
 0x831   : > { %5503 = dma.vmem_to_hbm [thread:$0]  (%p5776_p5), %s4718_s0, 128, %s4715_s30, %s4704_s2  }
 0x832 PF: > { %p5509_p13 = scmp.ge.s32.totalorder %s5643_s27, 2  ;;  %s4729_s28 = sand.u32 1, %s5631_s24  }
 0x833   : > { %s4730_s22 = scalar_lea.sflag [#allocation3], %s4729_s28 }
 0x834   : > { %p5506_p0 = pnand %p5509_p13, %p5780_p6 }
 0x836   : > { %p5507_p1 = pneg %p5506_p0 }
 0x838   : > { %5626 = dma.done.wait (%p5507_p1), %s4730_s22, 128  }
 0x839   : > { %5628 = vsyncadd (%p5507_p1), %s4730_s22, 4294967168  ;;  %s6738_s27 = sld [smem:[#allocation6_spill]]  ;;  %s6741_s24 = smov %s5635_s25 }
 0x83a   : > { %s6739_s23 = sld [smem:[#allocation5_spill]] }
 0x83b   : > { %s6740_s26 = sld [smem:[#allocation7_spill]] }
 0x83f   : > { %p27_p2 = scmp.ge.s32.totalorder %s6738_s27, 4  }
 0x840   : > { %s6742_s25 = smov %s6739_s23 }
 0x841   :  { %29 = sbr.rel (!%p27_p2) target bundleno = 8 (0x8), region = 123 }
 0x846   :  { %4735 = vsyncpa [#allocation3], 1 }
 0x847   :  { %4737 = vsyncpa [#allocation3 + $0x1], 1 }

</bundles_post_ra>
